<compile_context>
chip_gen: v7x
topology: tpu7x:2x2x1
jax: 0.10.0
libtpu: 0.0.40
codegen_flags: <defaults>
</compile_context>

<pallas_src>
import jax
import jax.numpy as jnp
from jax.experimental import pallas as pl
from jax.experimental.pallas import tpu as pltpu


def _round_up(v, m):
    return ((v + m - 1) // m) * m


# ----------------------------------------------------------------------------
# in-kernel helpers
# ----------------------------------------------------------------------------
def _sigmoid(x):
    # 1/(1+exp(-x)) with the divide on the EUP slot (approx reciprocal).
    return pl.reciprocal(1.0 + jnp.exp(-x), approx=True)


def _hswish(x):
    return x * jnp.clip(x + 3.0, 0.0, 6.0) * (1.0 / 6.0)


# ----------------------------------------------------------------------------
# parameter-slab layout (static row offsets, computed from dims only)
# ----------------------------------------------------------------------------
class Layout:
    """Row-offset tables for the 4 packed parameter slabs (all offsets static)."""

    def __init__(self, input_dim, output_dim):
        d = input_dim
        self.D = d
        self.mip = max(8, d // 32)
        self.dh = d // 2
        self.out = output_dim
        self.wide = max(128, _round_up(3 * d, 128), _round_up(output_dim, 128))
        # bf16 matmul weights, lane width = D
        self.w32, self.w32_rows = self._table([
            ('gdc_wt', d), ('rf_w1t', d), ('rf_wct', 9 * d),
            ('gat_wt', d), ('head_w1t', d)])
        # bf16 matmul weights, lane width = wide (>=128)
        self.w128, self.w128_rows = self._table([
            ('rf_whw', d), ('lstm_w', 4 * d), ('head_w2t', d)])
        # f32 biases / per-channel vectors, lane width = D
        self.b32, self.b32_rows = self._table([
            ('gdc_b', 1), ('bn1_shift', 1), ('rf_wgen', 9), ('rf_gsh', 9),
            ('rf_b1', 1), ('rf_bc', 1), ('gat_adst', 1), ('gat_asrc', 1),
            ('gat_scale', 1), ('gat_bias', 1), ('head_b1', 1)])
        # f32 biases, lane width = wide
        self.b128, self.b128_rows = self._table([
            ('rf_bhw', 1), ('lstm_b', 4), ('head_b2', 1)])

    @staticmethod
    def _table(blocks):
        offs, cur = {}, 0
        for name, rows in blocks:
            offs[name] = (cur, rows)
            cur += _round_up(rows, 8)        # 8-sublane aligned block starts
        return offs, cur


def _pack(table, total_rows, lanes, entries, dtype):
    slab = jnp.zeros((total_rows, lanes), dtype)
    for name, arr in entries.items():
        off, rows = table[name]
        assert arr.shape[0] == rows and arr.shape[1] <= lanes
        slab = slab.at[off:off + rows, :arr.shape[1]].set(arr.astype(dtype))
    return slab


# ----------------------------------------------------------------------------
# fused forward kernel (single program, everything VMEM-resident)
# ----------------------------------------------------------------------------
def _make_kernel(L):
    D = L.D
    f32 = jnp.float32
    bf16 = jnp.bfloat16
    w32o, w128o, b32o, b128o = L.w32, L.w128, L.b32, L.b128

    def kernel(adj_ref, mask_ref, x_ref, w32_ref, w128_ref, b32_ref, b128_ref, o_ref):
        n = x_ref.shape[0]

        def ld(ref, table, name):
            off, rows = table[name]
            return ref[pl.ds(off, rows), :]

        # ---- Conv1: GraphDiffusionConv  out = A_norm @ (x W' + b') (+bn1 shift) + ReLU
        h0 = jnp.dot(x_ref[...].astype(bf16), ld(w32_ref, w32o, 'gdc_wt'),
                     preferred_element_type=f32) + ld(b32_ref, b32o, 'gdc_b')
        x = jnp.dot(adj_ref[...], h0.astype(bf16),
                    preferred_element_type=f32) + ld(b32_ref, b32o, 'bn1_shift')
        x = jnp.maximum(x, 0.0)

        # ---- RFCA parameters, loaded once and reused by both invocations
        wgen = ld(b32_ref, b32o, 'rf_wgen')     # (9, D) centre taps (gen-BN folded)
        gsh = ld(b32_ref, b32o, 'rf_gsh')       # (9, D)
        w1t = ld(w32_ref, w32o, 'rf_w1t')       # (D, D) bf16 (mip lane-padded, bn1 folded)
        b1 = ld(b32_ref, b32o, 'rf_b1')         # (1, D)
        whw = ld(w128_ref, w128o, 'rf_whw')     # (D, wide) bf16: [W_h | W_w]
        bhw = ld(b128_ref, b128o, 'rf_bhw')     # (1, wide):     [b_h | b_w]
        wct = ld(w32_ref, w32o, 'rf_wct')       # (9D, D) bf16 final conv (bn2 folded)
        bc = ld(b32_ref, b32o, 'rf_bc')         # (1, D)
        third = 1.0 / 3.0

        def rfca(xx):
            # depthwise "generate" conv on a 1x1 map reduces to its centre tap;
            # nine 2-D (N,D) expressions (no 3-D temp)
            gf = [jnp.maximum(xx * wgen[k:k + 1, :] + gsh[k:k + 1, :], 0.0)
                  for k in range(9)]
            # adaptive average pools over the 3x3 receptive field
            xh = [(gf[3 * i] + gf[3 * i + 1] + gf[3 * i + 2]) * third for i in range(3)]
            xw = [(gf[j] + gf[3 + j] + gf[6 + j]) * third for j in range(3)]
            ys = jnp.concatenate(xh + xw, axis=0)                       # (6N, D)
            # conv1 + bn1 + h_swish on the whole (x_h | x_w) stack in ONE matmul
            y1 = _hswish(jnp.dot(ys.astype(bf16), w1t,
                                 preferred_element_type=f32) + b1)      # (6N, D)
            # conv_h and conv_w fused into one matmul
            hw = jnp.dot(y1.astype(bf16), whw,
                         preferred_element_type=f32) + bhw              # (6N, wide)
            ah = _sigmoid(hw[:3 * n, 0:D])                              # (3N, D)
            aw = _sigmoid(hw[3 * n:, D:2 * D])                          # (3N, D)
            # final Conv2d(C, C, 3, stride=3): single matmul with K = 9*C
            z = [gf[3 * i + j] * ah[i * n:(i + 1) * n, :] * aw[j * n:(j + 1) * n, :]
                 for i in range(3) for j in range(3)]
            zc = jnp.concatenate(z, axis=1)                             # (N, 9D)
            return jnp.dot(zc.astype(bf16), wct, preferred_element_type=f32) + bc

        # ---- Conv3: RFCA + bn2(folded) + ReLU
        x = jnp.maximum(rfca(x), 0.0)

        # ---- Conv2: GATConv (heads=1) + bn2 + ReLU
        hg = jnp.dot(x.astype(bf16), ld(w32_ref, w32o, 'gat_wt'),
                     preferred_element_type=f32)                        # (N, D)
        u = jnp.sum(hg * ld(b32_ref, b32o, 'gat_adst'), axis=1, keepdims=True)  # (N,1)
        s = jnp.sum(hg * ld(b32_ref, b32o, 'gat_asrc'), axis=1, keepdims=True)  # (N,1)
        e = u + jnp.transpose(s)                                        # (N, N)
        e = jnp.where(e >= 0.0, e, 0.2 * e)                             # leaky_relu(0.2)
        mask = mask_ref[...]
        e = jnp.where(mask > 0.0, e, -1e30)
        m = jnp.max(e, axis=1, keepdims=True)
        p = jnp.exp(e - m) * mask
        att = p * pl.reciprocal(jnp.sum(p, axis=1, keepdims=True), approx=True)
        x = jnp.dot(att.astype(bf16), hg.astype(bf16), preferred_element_type=f32) \
            * ld(b32_ref, b32o, 'gat_scale') + ld(b32_ref, b32o, 'gat_bias')
        x = jnp.maximum(x, 0.0)

        # ---- Conv3 again (shared RFCA weights) + bn2(folded) + ReLU
        x = jnp.maximum(rfca(x), 0.0)

        # ---- 4-layer LSTM, seq_len=1, h0=c0=0 (W_hh + forget gate pruned on host):
        #      one fused (N,D)@(D,wide) matmul per layer; gates = lane slices.
        lw_off, _ = w128o['lstm_w']
        lb_off, _ = b128o['lstm_b']
        h = x
        for l in range(4):
            wl = w128_ref[pl.ds(lw_off + l * D, D), :]                  # (D, wide) bf16
            bl = b128_ref[pl.ds(lb_off + l, 1), :]                      # (1, wide)
            g = jnp.dot(h.astype(bf16), wl, preferred_element_type=f32) + bl
            gi = _sigmoid(g[:, 0:D])
            gg = jnp.tanh(g[:, D:2 * D])
            go = _sigmoid(g[:, 2 * D:3 * D])
            h = go * jnp.tanh(gi * gg)

        # ---- head: Linear -> ReLU -> Linear -> log_softmax (lane-dense 128-wide)
        h1 = jnp.maximum(jnp.dot(h.astype(bf16), ld(w32_ref, w32o, 'head_w1t'),
                                 preferred_element_type=f32)
                         + ld(b32_ref, b32o, 'head_b1'), 0.0)
        logits = jnp.dot(h1.astype(bf16), ld(w128_ref, w128o, 'head_w2t'),
                         preferred_element_type=f32) + ld(b128_ref, b128o, 'head_b2')
        mx = jnp.max(logits, axis=1, keepdims=True)
        lse = mx + jnp.log(jnp.sum(jnp.exp(logits - mx), axis=1, keepdims=True))
        o_ref[...] = logits - lse

    return kernel


# ----------------------------------------------------------------------------
# glue: graph structure -> dense matrices (built once in JAX, streamed to VMEM)
# ----------------------------------------------------------------------------
def _dense_gdc_adjacency(edge_index, num_nodes):
    """A[t, s] = deg^-1/2[s] * deg^-1/2[t] for every edge s->t (incl. self loops)."""
    sl = jnp.arange(num_nodes, dtype=edge_index.dtype)
    row = jnp.concatenate([edge_index[0], sl])   # sources
    col = jnp.concatenate([edge_index[1], sl])   # targets
    deg = jnp.zeros((num_nodes,), jnp.float32).at[row].add(1.0)
    dis = deg ** -0.5
    vals = dis[row] * dis[col]
    return jnp.zeros((num_nodes, num_nodes), jnp.float32).at[col, row].add(vals)


def _gat_mask(edge_index, num_nodes):
    """mask[t, s] = 1 for every edge s->t plus self loops."""
    sl = jnp.arange(num_nodes, dtype=edge_index.dtype)
    row = jnp.concatenate([edge_index[0], sl])
    col = jnp.concatenate([edge_index[1], sl])
    return jnp.zeros((num_nodes, num_nodes), jnp.float32).at[col, row].set(1.0)


# ----------------------------------------------------------------------------
# parameter init (+ host-side BN folding / LSTM pruning / slab packing)
# ----------------------------------------------------------------------------
def init_params(key, input_dim, output_dim):
    d = input_dim
    c = d
    L = Layout(input_dim, output_dim)
    mip, dh, wide = L.mip, L.dh, L.wide
    eps = 1e-5
    # eval-mode BatchNorm with default stats: y = x / sqrt(1 + eps)
    bn_scale = (1.0 + eps) ** -0.5
    bn_shift = 0.0

    keys = iter(jax.random.split(key, 48))

    def nrm(shape, scale=0.1):
        return scale * jax.random.normal(next(keys), shape, dtype=jnp.float32)

    w32, w128, b32, b128 = {}, {}, {}, {}

    # -- GraphDiffusionConv.lin : Linear(d, d); bn1 scale folded into W and b
    gdc_w = nrm((d, d))
    gdc_b = nrm((d,))
    w32['gdc_wt'] = gdc_w.T * bn_scale
    b32['gdc_b'] = (gdc_b * bn_scale).reshape(1, d)
    b32['bn1_shift'] = jnp.full((1, d), bn_shift, jnp.float32)

    # -- RFCA(inp=c, oup=c, kernel_size=3, stride=1, reduction=32)
    gen_w = nrm((c * 9, 3, 3))                     # depthwise generate conv weight
    gen_center = gen_w[:, 1, 1].reshape(c, 9).T    # (9, c): only centre tap hits 1x1 input
    b32['rf_wgen'] = gen_center * bn_scale         # generate-BN folded into the taps
    b32['rf_gsh'] = jnp.zeros((9, c), jnp.float32)
    w1 = nrm((mip, c)); b1 = nrm((mip,))           # conv1 1x1 (rfca.bn1 folded)
    w32['rf_w1t'] = jnp.zeros((c, d), jnp.float32).at[:, :mip].set(w1.T * bn_scale)
    b32['rf_b1'] = jnp.zeros((1, d), jnp.float32).at[:, :mip].set((b1 * bn_scale)[None, :])
    wh = nrm((c, mip)); bhp = nrm((c,))            # conv_h 1x1
    ww = nrm((c, mip)); bwp = nrm((c,))            # conv_w 1x1
    whw = jnp.zeros((d, wide), jnp.float32)        # fused [W_h | W_w], mip rows live
    whw = whw.at[:mip, :c].set(wh.T).at[:mip, c:2 * c].set(ww.T)
    w128['rf_whw'] = whw
    b128['rf_bhw'] = (jnp.zeros((1, wide), jnp.float32)
                      .at[:, :c].set(bhp[None, :]).at[:, c:2 * c].set(bwp[None, :]))
    wc = nrm((c, c, 3, 3)); bcp = nrm((c,))        # final Conv2d(c, c, 3, stride=3)
    wct = jnp.transpose(wc, (2, 3, 1, 0)).reshape(9 * c, c)   # rows = (3i+j)*C + c_in
    w32['rf_wct'] = wct * bn_scale                 # outer bn2 folded into final conv
    b32['rf_bc'] = (bcp * bn_scale).reshape(1, c)

    # -- GATConv(d, d), heads=1 (lin no-bias, att_src/att_dst rows, output bias)
    gat_w = nrm((d, d))
    w32['gat_wt'] = gat_w.T
    b32['gat_adst'] = nrm((1, d))                  # per-target score weights (row)
    b32['gat_asrc'] = nrm((1, d))                  # per-source score weights (row)
    gat_b = nrm((d,))
    b32['gat_scale'] = jnp.full((1, d), bn_scale, jnp.float32)   # bn2 scale after GAT
    b32['gat_bias'] = (gat_b * bn_scale).reshape(1, d)           # GAT bias folded via bn2

    # -- 4-layer LSTM(d, d), h0=c0=0 -> W_hh and the forget gate never contribute.
    #    Fused per-layer weight: lanes [0:d)=i, [d:2d)=g, [2d:3d)=o (PyTorch order i,f,g,o).
    lw = jnp.zeros((4 * d, wide), jnp.float32)
    lb = jnp.zeros((4, wide), jnp.float32)
    for l in range(4):
        wih = nrm((4 * d, d))
        b = nrm((4 * d,)) + nrm((4 * d,))          # b_ih + b_hh
        lw = lw.at[l * d:(l + 1) * d, 0:d].set(wih[0:d].T)
        lw = lw.at[l * d:(l + 1) * d, d:2 * d].set(wih[2 * d:3 * d].T)
        lw = lw.at[l * d:(l + 1) * d, 2 * d:3 * d].set(wih[3 * d:4 * d].T)
        lb = lb.at[l, 0:d].set(b[0:d])
        lb = lb.at[l, d:2 * d].set(b[2 * d:3 * d])
        lb = lb.at[l, 2 * d:3 * d].set(b[3 * d:4 * d])
    w128['lstm_w'] = lw
    b128['lstm_b'] = lb

    # -- head: Linear(d, d//2) -> ReLU -> Linear(d//2, out); logits lane-padded to 128
    hw1 = nrm((dh, d)); hb1 = nrm((dh,))
    hw2 = nrm((output_dim, dh)); hb2 = nrm((output_dim,))
    w32['head_w1t'] = jnp.zeros((d, d), jnp.float32).at[:, :dh].set(hw1.T)
    b32['head_b1'] = jnp.zeros((1, d), jnp.float32).at[:, :dh].set(hb1[None, :])
    w128['head_w2t'] = jnp.zeros((d, wide), jnp.float32).at[:dh, :output_dim].set(hw2.T)
    b128['head_b2'] = (jnp.full((1, wide), -1e30, jnp.float32)
                       .at[:, :output_dim].set(hb2[None, :]))

    params = {
        'w32': _pack(L.w32, L.w32_rows, d, w32, jnp.bfloat16),
        'w128': _pack(L.w128, L.w128_rows, wide, w128, jnp.bfloat16),
        'b32': _pack(L.b32, L.b32_rows, d, b32, jnp.float32),
        'b128': _pack(L.b128, L.b128_rows, wide, b128, jnp.float32),
    }
    return params, L


# ----------------------------------------------------------------------------
# forward pass: ONE fused pallas_call with 7 inputs
# ----------------------------------------------------------------------------
def lstm_rfca_forward(params, x, edge_index, layout, output_dim):
    n, _ = x.shape
    adj = _dense_gdc_adjacency(edge_index, n).astype(jnp.bfloat16)   # MXU operand
    mask = _gat_mask(edge_index, n)                                  # f32 (VPU select)

    args = (adj, mask, x,
            params['w32'], params['w128'], params['b32'], params['b128'])

    # TODO(synk): for non-toy N, row-tile only the O(N^2) adj/mask (+x/out rows)
    # with grid=(cdiv(N,TM),), dimension_semantics=("parallel",) and a per-chip
    # vmem_limit_bytes (TM~256 on v7x's 64 MiB, ~512 on v5e/v6e). At N=8 the whole
    # problem (~110 KB of params) is a single VMEM-resident program.
    out_pad = pl.pallas_call(
        _make_kernel(layout),
        out_shape=jax.ShapeDtypeStruct((n, layout.wide), jnp.float32),
        in_specs=[pl.BlockSpec(memory_space=pltpu.MemorySpace.VMEM)] * len(args),
        out_specs=pl.BlockSpec(memory_space=pltpu.MemorySpace.VMEM),
    )(*args)
    return out_pad[:, :output_dim]


# ----------------------------------------------------------------------------
if __name__ == "__main__":
    key = jax.random.PRNGKey(0)
    k_x, k_p = jax.random.split(key)

    input_dim, output_dim, num_nodes = 32, 4, 8

    # node features (data.x) and a bidirectional ring graph (data.edge_index)
    x = jax.random.normal(k_x, (num_nodes, input_dim), dtype=jnp.float32)
    src = jnp.arange(num_nodes, dtype=jnp.int32)
    dst = (src + 1) % num_nodes
    edge_index = jnp.stack([jnp.concatenate([src, dst]),
                            jnp.concatenate([dst, src])])       # (2, 16)

    params, layout = init_params(k_p, input_dim, output_dim)

    fwd = jax.jit(lambda p, xx, ei: lstm_rfca_forward(p, xx, ei, layout, output_dim))
    out = jax.block_until_ready(fwd(params, x, edge_index))

    assert out.shape == (num_nodes, output_dim)
    assert bool(jnp.all(jnp.isfinite(out)))
    # rows of log_softmax must exponentiate-sum to 1
    assert bool(jnp.allclose(jnp.sum(jnp.exp(out), axis=1), 1.0, atol=1e-4))
    print("KERNEL_OK")
</pallas_src>

<mosaic_0001>
module attributes {stable_mosaic.version = 11 : i64} {
  func.func @kernel(%arg0: memref<8x8xbf16, #tpu.memory_space<vmem>>, %arg1: memref<8x8xf32, #tpu.memory_space<vmem>>, %arg2: memref<8x32xf32, #tpu.memory_space<vmem>>, %arg3: memref<416x32xbf16, #tpu.memory_space<vmem>>, %arg4: memref<192x128xbf16, #tpu.memory_space<vmem>>, %arg5: memref<104x32xf32, #tpu.memory_space<vmem>>, %arg6: memref<24x128xf32, #tpu.memory_space<vmem>>, %arg7: memref<8x128xf32, #tpu.memory_space<vmem>>) attributes {dimension_semantics = [], scalar_prefetch = 0 : i64, scratch_operands = 0 : i64, tpu.core_type = #tpu.core_type<tc>} {
    %c0 = arith.constant 0 : index
    %c0_0 = arith.constant 0 : index
    %0 = vector.load %arg2[%c0, %c0_0] : memref<8x32xf32, #tpu.memory_space<vmem>>, vector<8x32xf32>
    %1 = arith.truncf %0 : vector<8x32xf32> to vector<8x32xbf16>
    %c0_1 = arith.constant 0 : index
    %c0_2 = arith.constant 0 : index
    %2 = vector.load %arg3[%c0_1, %c0_2] : memref<416x32xbf16, #tpu.memory_space<vmem>>, vector<32x32xbf16>
    %cst = arith.constant dense<0.000000e+00> : vector<8x32xf32>
    %3 = tpu.matmul %1, %2, %cst {dimension_numbers = #tpu.dot_dimension_numbers<[1], [0], [0], [1], [0, 0, 1, 1], [], []>} : vector<8x32xbf16>, vector<32x32xbf16>, vector<8x32xf32> -> vector<8x32xf32>
    %c0_3 = arith.constant 0 : index
    %c0_4 = arith.constant 0 : index
    %4 = vector.load %arg5[%c0_3, %c0_4] : memref<104x32xf32, #tpu.memory_space<vmem>>, vector<1x32xf32>
    %5 = vector.broadcast %4 : vector<1x32xf32> to vector<8x32xf32>
    %6 = arith.addf %3, %5 : vector<8x32xf32>
    %c0_5 = arith.constant 0 : index
    %c0_6 = arith.constant 0 : index
    %7 = vector.load %arg0[%c0_5, %c0_6] : memref<8x8xbf16, #tpu.memory_space<vmem>>, vector<8x8xbf16>
    %8 = arith.truncf %6 : vector<8x32xf32> to vector<8x32xbf16>
    %cst_7 = arith.constant dense<0.000000e+00> : vector<8x32xf32>
    %9 = tpu.matmul %7, %8, %cst_7 {dimension_numbers = #tpu.dot_dimension_numbers<[1], [0], [0], [1], [0, 0, 1, 1], [], []>} : vector<8x8xbf16>, vector<8x32xbf16>, vector<8x32xf32> -> vector<8x32xf32>
    %c8 = arith.constant 8 : index
    %c0_8 = arith.constant 0 : index
    %10 = vector.load %arg5[%c8, %c0_8] : memref<104x32xf32, #tpu.memory_space<vmem>>, vector<1x32xf32>
    %11 = vector.broadcast %10 : vector<1x32xf32> to vector<8x32xf32>
    %12 = arith.addf %9, %11 : vector<8x32xf32>
    %cst_9 = arith.constant 0.000000e+00 : f32
    %13 = vector.broadcast %cst_9 : f32 to vector<8x32xf32>
    %14 = arith.maximumf %12, %13 : vector<8x32xf32>
    %c16 = arith.constant 16 : index
    %c0_10 = arith.constant 0 : index
    %15 = vector.load %arg5[%c16, %c0_10] : memref<104x32xf32, #tpu.memory_space<vmem>>, vector<9x32xf32>
    %c32 = arith.constant 32 : index
    %c0_11 = arith.constant 0 : index
    %16 = vector.load %arg5[%c32, %c0_11] : memref<104x32xf32, #tpu.memory_space<vmem>>, vector<9x32xf32>
    %c32_12 = arith.constant 32 : index
    %c0_13 = arith.constant 0 : index
    %17 = vector.load %arg3[%c32_12, %c0_13] : memref<416x32xbf16, #tpu.memory_space<vmem>>, vector<32x32xbf16>
    %c48 = arith.constant 48 : index
    %c0_14 = arith.constant 0 : index
    %18 = vector.load %arg5[%c48, %c0_14] : memref<104x32xf32, #tpu.memory_space<vmem>>, vector<1x32xf32>
    %c0_15 = arith.constant 0 : index
    %c0_16 = arith.constant 0 : index
    %19 = vector.load %arg4[%c0_15, %c0_16] : memref<192x128xbf16, #tpu.memory_space<vmem>>, vector<32x128xbf16>
    %c0_17 = arith.constant 0 : index
    %c0_18 = arith.constant 0 : index
    %20 = vector.load %arg6[%c0_17, %c0_18] : memref<24x128xf32, #tpu.memory_space<vmem>>, vector<1x128xf32>
    %c64 = arith.constant 64 : index
    %c0_19 = arith.constant 0 : index
    %21 = vector.load %arg3[%c64, %c0_19] : memref<416x32xbf16, #tpu.memory_space<vmem>>, vector<288x32xbf16>
    %c56 = arith.constant 56 : index
    %c0_20 = arith.constant 0 : index
    %22 = vector.load %arg5[%c56, %c0_20] : memref<104x32xf32, #tpu.memory_space<vmem>>, vector<1x32xf32>
    %23 = vector.extract_strided_slice %15 {offsets = [0, 0], sizes = [1, 32], strides = [1, 1]} : vector<9x32xf32> to vector<1x32xf32>
    %24 = vector.broadcast %23 : vector<1x32xf32> to vector<8x32xf32>
    %25 = arith.mulf %14, %24 : vector<8x32xf32>
    %26 = vector.extract_strided_slice %16 {offsets = [0, 0], sizes = [1, 32], strides = [1, 1]} : vector<9x32xf32> to vector<1x32xf32>
    %27 = vector.broadcast %26 : vector<1x32xf32> to vector<8x32xf32>
    %28 = arith.addf %25, %27 : vector<8x32xf32>
    %cst_21 = arith.constant 0.000000e+00 : f32
    %29 = vector.broadcast %cst_21 : f32 to vector<8x32xf32>
    %30 = arith.maximumf %28, %29 : vector<8x32xf32>
    %31 = vector.extract_strided_slice %15 {offsets = [1, 0], sizes = [1, 32], strides = [1, 1]} : vector<9x32xf32> to vector<1x32xf32>
    %32 = vector.broadcast %31 : vector<1x32xf32> to vector<8x32xf32>
    %33 = arith.mulf %14, %32 : vector<8x32xf32>
    %34 = vector.extract_strided_slice %16 {offsets = [1, 0], sizes = [1, 32], strides = [1, 1]} : vector<9x32xf32> to vector<1x32xf32>
    %35 = vector.broadcast %34 : vector<1x32xf32> to vector<8x32xf32>
    %36 = arith.addf %33, %35 : vector<8x32xf32>
    %cst_22 = arith.constant 0.000000e+00 : f32
    %37 = vector.broadcast %cst_22 : f32 to vector<8x32xf32>
    %38 = arith.maximumf %36, %37 : vector<8x32xf32>
    %39 = vector.extract_strided_slice %15 {offsets = [2, 0], sizes = [1, 32], strides = [1, 1]} : vector<9x32xf32> to vector<1x32xf32>
    %40 = vector.broadcast %39 : vector<1x32xf32> to vector<8x32xf32>
    %41 = arith.mulf %14, %40 : vector<8x32xf32>
    %42 = vector.extract_strided_slice %16 {offsets = [2, 0], sizes = [1, 32], strides = [1, 1]} : vector<9x32xf32> to vector<1x32xf32>
    %43 = vector.broadcast %42 : vector<1x32xf32> to vector<8x32xf32>
    %44 = arith.addf %41, %43 : vector<8x32xf32>
    %cst_23 = arith.constant 0.000000e+00 : f32
    %45 = vector.broadcast %cst_23 : f32 to vector<8x32xf32>
    %46 = arith.maximumf %44, %45 : vector<8x32xf32>
    %47 = vector.extract_strided_slice %15 {offsets = [3, 0], sizes = [1, 32], strides = [1, 1]} : vector<9x32xf32> to vector<1x32xf32>
    %48 = vector.broadcast %47 : vector<1x32xf32> to vector<8x32xf32>
    %49 = arith.mulf %14, %48 : vector<8x32xf32>
    %50 = vector.extract_strided_slice %16 {offsets = [3, 0], sizes = [1, 32], strides = [1, 1]} : vector<9x32xf32> to vector<1x32xf32>
    %51 = vector.broadcast %50 : vector<1x32xf32> to vector<8x32xf32>
    %52 = arith.addf %49, %51 : vector<8x32xf32>
    %cst_24 = arith.constant 0.000000e+00 : f32
    %53 = vector.broadcast %cst_24 : f32 to vector<8x32xf32>
    %54 = arith.maximumf %52, %53 : vector<8x32xf32>
    %55 = vector.extract_strided_slice %15 {offsets = [4, 0], sizes = [1, 32], strides = [1, 1]} : vector<9x32xf32> to vector<1x32xf32>
    %56 = vector.broadcast %55 : vector<1x32xf32> to vector<8x32xf32>
    %57 = arith.mulf %14, %56 : vector<8x32xf32>
    %58 = vector.extract_strided_slice %16 {offsets = [4, 0], sizes = [1, 32], strides = [1, 1]} : vector<9x32xf32> to vector<1x32xf32>
    %59 = vector.broadcast %58 : vector<1x32xf32> to vector<8x32xf32>
    %60 = arith.addf %57, %59 : vector<8x32xf32>
    %cst_25 = arith.constant 0.000000e+00 : f32
    %61 = vector.broadcast %cst_25 : f32 to vector<8x32xf32>
    %62 = arith.maximumf %60, %61 : vector<8x32xf32>
    %63 = vector.extract_strided_slice %15 {offsets = [5, 0], sizes = [1, 32], strides = [1, 1]} : vector<9x32xf32> to vector<1x32xf32>
    %64 = vector.broadcast %63 : vector<1x32xf32> to vector<8x32xf32>
    %65 = arith.mulf %14, %64 : vector<8x32xf32>
    %66 = vector.extract_strided_slice %16 {offsets = [5, 0], sizes = [1, 32], strides = [1, 1]} : vector<9x32xf32> to vector<1x32xf32>
    %67 = vector.broadcast %66 : vector<1x32xf32> to vector<8x32xf32>
    %68 = arith.addf %65, %67 : vector<8x32xf32>
    %cst_26 = arith.constant 0.000000e+00 : f32
    %69 = vector.broadcast %cst_26 : f32 to vector<8x32xf32>
    %70 = arith.maximumf %68, %69 : vector<8x32xf32>
    %71 = vector.extract_strided_slice %15 {offsets = [6, 0], sizes = [1, 32], strides = [1, 1]} : vector<9x32xf32> to vector<1x32xf32>
    %72 = vector.broadcast %71 : vector<1x32xf32> to vector<8x32xf32>
    %73 = arith.mulf %14, %72 : vector<8x32xf32>
    %74 = vector.extract_strided_slice %16 {offsets = [6, 0], sizes = [1, 32], strides = [1, 1]} : vector<9x32xf32> to vector<1x32xf32>
    %75 = vector.broadcast %74 : vector<1x32xf32> to vector<8x32xf32>
    %76 = arith.addf %73, %75 : vector<8x32xf32>
    %cst_27 = arith.constant 0.000000e+00 : f32
    %77 = vector.broadcast %cst_27 : f32 to vector<8x32xf32>
    %78 = arith.maximumf %76, %77 : vector<8x32xf32>
    %79 = vector.extract_strided_slice %15 {offsets = [7, 0], sizes = [1, 32], strides = [1, 1]} : vector<9x32xf32> to vector<1x32xf32>
    %80 = vector.broadcast %79 : vector<1x32xf32> to vector<8x32xf32>
    %81 = arith.mulf %14, %80 : vector<8x32xf32>
    %82 = vector.extract_strided_slice %16 {offsets = [7, 0], sizes = [1, 32], strides = [1, 1]} : vector<9x32xf32> to vector<1x32xf32>
    %83 = vector.broadcast %82 : vector<1x32xf32> to vector<8x32xf32>
    %84 = arith.addf %81, %83 : vector<8x32xf32>
    %cst_28 = arith.constant 0.000000e+00 : f32
    %85 = vector.broadcast %cst_28 : f32 to vector<8x32xf32>
    %86 = arith.maximumf %84, %85 : vector<8x32xf32>
    %87 = vector.extract_strided_slice %15 {offsets = [8, 0], sizes = [1, 32], strides = [1, 1]} : vector<9x32xf32> to vector<1x32xf32>
    %88 = vector.broadcast %87 : vector<1x32xf32> to vector<8x32xf32>
    %89 = arith.mulf %14, %88 : vector<8x32xf32>
    %90 = vector.extract_strided_slice %16 {offsets = [8, 0], sizes = [1, 32], strides = [1, 1]} : vector<9x32xf32> to vector<1x32xf32>
    %91 = vector.broadcast %90 : vector<1x32xf32> to vector<8x32xf32>
    %92 = arith.addf %89, %91 : vector<8x32xf32>
    %cst_29 = arith.constant 0.000000e+00 : f32
    %93 = vector.broadcast %cst_29 : f32 to vector<8x32xf32>
    %94 = arith.maximumf %92, %93 : vector<8x32xf32>
    %95 = arith.addf %30, %38 : vector<8x32xf32>
    %96 = arith.addf %95, %46 : vector<8x32xf32>
    %cst_30 = arith.constant 0.333333343 : f32
    %97 = vector.broadcast %cst_30 : f32 to vector<8x32xf32>
    %98 = arith.mulf %96, %97 : vector<8x32xf32>
    %99 = arith.addf %54, %62 : vector<8x32xf32>
    %100 = arith.addf %99, %70 : vector<8x32xf32>
    %cst_31 = arith.constant 0.333333343 : f32
    %101 = vector.broadcast %cst_31 : f32 to vector<8x32xf32>
    %102 = arith.mulf %100, %101 : vector<8x32xf32>
    %103 = arith.addf %78, %86 : vector<8x32xf32>
    %104 = arith.addf %103, %94 : vector<8x32xf32>
    %cst_32 = arith.constant 0.333333343 : f32
    %105 = vector.broadcast %cst_32 : f32 to vector<8x32xf32>
    %106 = arith.mulf %104, %105 : vector<8x32xf32>
    %107 = arith.addf %30, %54 : vector<8x32xf32>
    %108 = arith.addf %107, %78 : vector<8x32xf32>
    %cst_33 = arith.constant 0.333333343 : f32
    %109 = vector.broadcast %cst_33 : f32 to vector<8x32xf32>
    %110 = arith.mulf %108, %109 : vector<8x32xf32>
    %111 = arith.addf %38, %62 : vector<8x32xf32>
    %112 = arith.addf %111, %86 : vector<8x32xf32>
    %cst_34 = arith.constant 0.333333343 : f32
    %113 = vector.broadcast %cst_34 : f32 to vector<8x32xf32>
    %114 = arith.mulf %112, %113 : vector<8x32xf32>
    %115 = arith.addf %46, %70 : vector<8x32xf32>
    %116 = arith.addf %115, %94 : vector<8x32xf32>
    %cst_35 = arith.constant 0.333333343 : f32
    %117 = vector.broadcast %cst_35 : f32 to vector<8x32xf32>
    %118 = arith.mulf %116, %117 : vector<8x32xf32>
    %119 = tpu.concatenate %98, %102, %106, %110, %114, %118 in 0 : vector<8x32xf32>, vector<8x32xf32>, vector<8x32xf32>, vector<8x32xf32>, vector<8x32xf32>, vector<8x32xf32> -> vector<48x32xf32>
    %120 = arith.truncf %119 : vector<48x32xf32> to vector<48x32xbf16>
    %cst_36 = arith.constant dense<0.000000e+00> : vector<48x32xf32>
    %121 = tpu.matmul %120, %17, %cst_36 {dimension_numbers = #tpu.dot_dimension_numbers<[1], [0], [0], [1], [0, 0, 1, 1], [], []>} : vector<48x32xbf16>, vector<32x32xbf16>, vector<48x32xf32> -> vector<48x32xf32>
    %122 = vector.broadcast %18 : vector<1x32xf32> to vector<48x32xf32>
    %123 = arith.addf %121, %122 : vector<48x32xf32>
    %cst_37 = arith.constant 3.000000e+00 : f32
    %124 = vector.broadcast %cst_37 : f32 to vector<48x32xf32>
    %125 = arith.addf %123, %124 : vector<48x32xf32>
    %cst_38 = arith.constant 0.000000e+00 : f32
    %cst_39 = arith.constant 6.000000e+00 : f32
    %126 = vector.broadcast %cst_38 : f32 to vector<48x32xf32>
    %127 = arith.maximumf %126, %125 : vector<48x32xf32>
    %128 = vector.broadcast %cst_39 : f32 to vector<48x32xf32>
    %129 = arith.minimumf %128, %127 : vector<48x32xf32>
    %130 = arith.mulf %123, %129 : vector<48x32xf32>
    %cst_40 = arith.constant 0.166666672 : f32
    %131 = vector.broadcast %cst_40 : f32 to vector<48x32xf32>
    %132 = arith.mulf %130, %131 : vector<48x32xf32>
    %133 = arith.truncf %132 : vector<48x32xf32> to vector<48x32xbf16>
    %cst_41 = arith.constant dense<0.000000e+00> : vector<48x128xf32>
    %134 = tpu.matmul %133, %19, %cst_41 {dimension_numbers = #tpu.dot_dimension_numbers<[1], [0], [0], [1], [0, 0, 1, 1], [], []>} : vector<48x32xbf16>, vector<32x128xbf16>, vector<48x128xf32> -> vector<48x128xf32>
    %135 = vector.broadcast %20 : vector<1x128xf32> to vector<48x128xf32>
    %136 = arith.addf %134, %135 : vector<48x128xf32>
    %137 = vector.extract_strided_slice %136 {offsets = [0, 0], sizes = [24, 32], strides = [1, 1]} : vector<48x128xf32> to vector<24x32xf32>
    %cst_42 = arith.constant 0.000000e+00 : f32
    %138 = vector.broadcast %cst_42 : f32 to vector<24x32xf32>
    %139 = arith.subf %138, %137 : vector<24x32xf32>
    %140 = math.exp %139 : vector<24x32xf32>
    %cst_43 = arith.constant 1.000000e+00 : f32
    %141 = vector.broadcast %cst_43 : f32 to vector<24x32xf32>
    %142 = arith.addf %141, %140 : vector<24x32xf32>
    %143 = tpu.reciprocal %142 {approx = true} : vector<24x32xf32> -> vector<24x32xf32>
    %144 = vector.extract_strided_slice %136 {offsets = [24, 32], sizes = [24, 32], strides = [1, 1]} : vector<48x128xf32> to vector<24x32xf32>
    %cst_44 = arith.constant 0.000000e+00 : f32
    %145 = vector.broadcast %cst_44 : f32 to vector<24x32xf32>
    %146 = arith.subf %145, %144 : vector<24x32xf32>
    %147 = math.exp %146 : vector<24x32xf32>
    %cst_45 = arith.constant 1.000000e+00 : f32
    %148 = vector.broadcast %cst_45 : f32 to vector<24x32xf32>
    %149 = arith.addf %148, %147 : vector<24x32xf32>
    %150 = tpu.reciprocal %149 {approx = true} : vector<24x32xf32> -> vector<24x32xf32>
    %151 = vector.extract_strided_slice %143 {offsets = [0, 0], sizes = [8, 32], strides = [1, 1]} : vector<24x32xf32> to vector<8x32xf32>
    %152 = arith.mulf %30, %151 : vector<8x32xf32>
    %153 = vector.extract_strided_slice %150 {offsets = [0, 0], sizes = [8, 32], strides = [1, 1]} : vector<24x32xf32> to vector<8x32xf32>
    %154 = arith.mulf %152, %153 : vector<8x32xf32>
    %155 = vector.extract_strided_slice %143 {offsets = [0, 0], sizes = [8, 32], strides = [1, 1]} : vector<24x32xf32> to vector<8x32xf32>
    %156 = arith.mulf %38, %155 : vector<8x32xf32>
    %157 = vector.extract_strided_slice %150 {offsets = [8, 0], sizes = [8, 32], strides = [1, 1]} : vector<24x32xf32> to vector<8x32xf32>
    %158 = arith.mulf %156, %157 : vector<8x32xf32>
    %159 = vector.extract_strided_slice %143 {offsets = [0, 0], sizes = [8, 32], strides = [1, 1]} : vector<24x32xf32> to vector<8x32xf32>
    %160 = arith.mulf %46, %159 : vector<8x32xf32>
    %161 = vector.extract_strided_slice %150 {offsets = [16, 0], sizes = [8, 32], strides = [1, 1]} : vector<24x32xf32> to vector<8x32xf32>
    %162 = arith.mulf %160, %161 : vector<8x32xf32>
    %163 = vector.extract_strided_slice %143 {offsets = [8, 0], sizes = [8, 32], strides = [1, 1]} : vector<24x32xf32> to vector<8x32xf32>
    %164 = arith.mulf %54, %163 : vector<8x32xf32>
    %165 = vector.extract_strided_slice %150 {offsets = [0, 0], sizes = [8, 32], strides = [1, 1]} : vector<24x32xf32> to vector<8x32xf32>
    %166 = arith.mulf %164, %165 : vector<8x32xf32>
    %167 = vector.extract_strided_slice %143 {offsets = [8, 0], sizes = [8, 32], strides = [1, 1]} : vector<24x32xf32> to vector<8x32xf32>
    %168 = arith.mulf %62, %167 : vector<8x32xf32>
    %169 = vector.extract_strided_slice %150 {offsets = [8, 0], sizes = [8, 32], strides = [1, 1]} : vector<24x32xf32> to vector<8x32xf32>
    %170 = arith.mulf %168, %169 : vector<8x32xf32>
    %171 = vector.extract_strided_slice %143 {offsets = [8, 0], sizes = [8, 32], strides = [1, 1]} : vector<24x32xf32> to vector<8x32xf32>
    %172 = arith.mulf %70, %171 : vector<8x32xf32>
    %173 = vector.extract_strided_slice %150 {offsets = [16, 0], sizes = [8, 32], strides = [1, 1]} : vector<24x32xf32> to vector<8x32xf32>
    %174 = arith.mulf %172, %173 : vector<8x32xf32>
    %175 = vector.extract_strided_slice %143 {offsets = [16, 0], sizes = [8, 32], strides = [1, 1]} : vector<24x32xf32> to vector<8x32xf32>
    %176 = arith.mulf %78, %175 : vector<8x32xf32>
    %177 = vector.extract_strided_slice %150 {offsets = [0, 0], sizes = [8, 32], strides = [1, 1]} : vector<24x32xf32> to vector<8x32xf32>
    %178 = arith.mulf %176, %177 : vector<8x32xf32>
    %179 = vector.extract_strided_slice %143 {offsets = [16, 0], sizes = [8, 32], strides = [1, 1]} : vector<24x32xf32> to vector<8x32xf32>
    %180 = arith.mulf %86, %179 : vector<8x32xf32>
    %181 = vector.extract_strided_slice %150 {offsets = [8, 0], sizes = [8, 32], strides = [1, 1]} : vector<24x32xf32> to vector<8x32xf32>
    %182 = arith.mulf %180, %181 : vector<8x32xf32>
    %183 = vector.extract_strided_slice %143 {offsets = [16, 0], sizes = [8, 32], strides = [1, 1]} : vector<24x32xf32> to vector<8x32xf32>
    %184 = arith.mulf %94, %183 : vector<8x32xf32>
    %185 = vector.extract_strided_slice %150 {offsets = [16, 0], sizes = [8, 32], strides = [1, 1]} : vector<24x32xf32> to vector<8x32xf32>
    %186 = arith.mulf %184, %185 : vector<8x32xf32>
    %187 = tpu.concatenate %154, %158, %162, %166, %170, %174, %178, %182, %186 in 1 : vector<8x32xf32>, vector<8x32xf32>, vector<8x32xf32>, vector<8x32xf32>, vector<8x32xf32>, vector<8x32xf32>, vector<8x32xf32>, vector<8x32xf32>, vector<8x32xf32> -> vector<8x288xf32>
    %188 = arith.truncf %187 : vector<8x288xf32> to vector<8x288xbf16>
    %cst_46 = arith.constant dense<0.000000e+00> : vector<8x32xf32>
    %189 = tpu.matmul %188, %21, %cst_46 {dimension_numbers = #tpu.dot_dimension_numbers<[1], [0], [0], [1], [0, 0, 1, 1], [], []>} : vector<8x288xbf16>, vector<288x32xbf16>, vector<8x32xf32> -> vector<8x32xf32>
    %190 = vector.broadcast %22 : vector<1x32xf32> to vector<8x32xf32>
    %191 = arith.addf %189, %190 : vector<8x32xf32>
    %cst_47 = arith.constant 0.000000e+00 : f32
    %192 = vector.broadcast %cst_47 : f32 to vector<8x32xf32>
    %193 = arith.maximumf %191, %192 : vector<8x32xf32>
    %194 = arith.truncf %193 : vector<8x32xf32> to vector<8x32xbf16>
    %c352 = arith.constant 352 : index
    %c0_48 = arith.constant 0 : index
    %195 = vector.load %arg3[%c352, %c0_48] : memref<416x32xbf16, #tpu.memory_space<vmem>>, vector<32x32xbf16>
    %cst_49 = arith.constant dense<0.000000e+00> : vector<8x32xf32>
    %196 = tpu.matmul %194, %195, %cst_49 {dimension_numbers = #tpu.dot_dimension_numbers<[1], [0], [0], [1], [0, 0, 1, 1], [], []>} : vector<8x32xbf16>, vector<32x32xbf16>, vector<8x32xf32> -> vector<8x32xf32>
    %c64_50 = arith.constant 64 : index
    %c0_51 = arith.constant 0 : index
    %197 = vector.load %arg5[%c64_50, %c0_51] : memref<104x32xf32, #tpu.memory_space<vmem>>, vector<1x32xf32>
    %198 = vector.broadcast %197 : vector<1x32xf32> to vector<8x32xf32>
    %199 = arith.mulf %196, %198 : vector<8x32xf32>
    %cst_52 = arith.constant dense<0.000000e+00> : vector<8xf32>
    %200 = vector.multi_reduction <add>, %199, %cst_52 [1] : vector<8x32xf32> to vector<8xf32>
    %201 = vector.shape_cast %200 : vector<8xf32> to vector<8x1xf32>
    %c72 = arith.constant 72 : index
    %c0_53 = arith.constant 0 : index
    %202 = vector.load %arg5[%c72, %c0_53] : memref<104x32xf32, #tpu.memory_space<vmem>>, vector<1x32xf32>
    %203 = vector.broadcast %202 : vector<1x32xf32> to vector<8x32xf32>
    %204 = arith.mulf %196, %203 : vector<8x32xf32>
    %cst_54 = arith.constant dense<0.000000e+00> : vector<8xf32>
    %205 = vector.multi_reduction <add>, %204, %cst_54 [1] : vector<8x32xf32> to vector<8xf32>
    %206 = vector.shape_cast %205 : vector<8xf32> to vector<8x1xf32>
    %207 = tpu.transpose %206, [1, 0] : vector<8x1xf32> -> vector<1x8xf32>
    %208 = vector.broadcast %201 : vector<8x1xf32> to vector<8x8xf32>
    %209 = vector.broadcast %207 : vector<1x8xf32> to vector<8x8xf32>
    %210 = arith.addf %208, %209 : vector<8x8xf32>
    %cst_55 = arith.constant 0.000000e+00 : f32
    %211 = vector.broadcast %cst_55 : f32 to vector<8x8xf32>
    %212 = arith.cmpf oge, %210, %211 : vector<8x8xf32>
    %cst_56 = arith.constant 2.000000e-01 : f32
    %213 = vector.broadcast %cst_56 : f32 to vector<8x8xf32>
    %214 = arith.mulf %213, %210 : vector<8x8xf32>
    %215 = arith.select %212, %210, %214 : vector<8x8xi1>, vector<8x8xf32>
    %c0_57 = arith.constant 0 : index
    %c0_58 = arith.constant 0 : index
    %216 = vector.load %arg1[%c0_57, %c0_58] : memref<8x8xf32, #tpu.memory_space<vmem>>, vector<8x8xf32>
    %cst_59 = arith.constant 0.000000e+00 : f32
    %217 = vector.broadcast %cst_59 : f32 to vector<8x8xf32>
    %218 = arith.cmpf ogt, %216, %217 : vector<8x8xf32>
    %cst_60 = arith.constant -1.000000e+30 : f32
    %219 = vector.broadcast %cst_60 : f32 to vector<8x8xf32>
    %220 = arith.select %218, %215, %219 : vector<8x8xi1>, vector<8x8xf32>
    %cst_61 = arith.constant dense<0xFF800000> : vector<8xf32>
    %221 = vector.multi_reduction <maximumf>, %220, %cst_61 [1] : vector<8x8xf32> to vector<8xf32>
    %222 = vector.shape_cast %221 : vector<8xf32> to vector<8x1xf32>
    %223 = vector.broadcast %222 : vector<8x1xf32> to vector<8x8xf32>
    %224 = arith.subf %220, %223 : vector<8x8xf32>
    %225 = math.exp %224 : vector<8x8xf32>
    %226 = arith.mulf %225, %216 : vector<8x8xf32>
    %cst_62 = arith.constant dense<0.000000e+00> : vector<8xf32>
    %227 = vector.multi_reduction <add>, %226, %cst_62 [1] : vector<8x8xf32> to vector<8xf32>
    %228 = vector.shape_cast %227 : vector<8xf32> to vector<8x1xf32>
    %229 = tpu.reciprocal %228 {approx = true} : vector<8x1xf32> -> vector<8x1xf32>
    %230 = vector.broadcast %229 : vector<8x1xf32> to vector<8x8xf32>
    %231 = arith.mulf %226, %230 : vector<8x8xf32>
    %232 = arith.truncf %231 : vector<8x8xf32> to vector<8x8xbf16>
    %233 = arith.truncf %196 : vector<8x32xf32> to vector<8x32xbf16>
    %cst_63 = arith.constant dense<0.000000e+00> : vector<8x32xf32>
    %234 = tpu.matmul %232, %233, %cst_63 {dimension_numbers = #tpu.dot_dimension_numbers<[1], [0], [0], [1], [0, 0, 1, 1], [], []>} : vector<8x8xbf16>, vector<8x32xbf16>, vector<8x32xf32> -> vector<8x32xf32>
    %c80 = arith.constant 80 : index
    %c0_64 = arith.constant 0 : index
    %235 = vector.load %arg5[%c80, %c0_64] : memref<104x32xf32, #tpu.memory_space<vmem>>, vector<1x32xf32>
    %236 = vector.broadcast %235 : vector<1x32xf32> to vector<8x32xf32>
    %237 = arith.mulf %234, %236 : vector<8x32xf32>
    %c88 = arith.constant 88 : index
    %c0_65 = arith.constant 0 : index
    %238 = vector.load %arg5[%c88, %c0_65] : memref<104x32xf32, #tpu.memory_space<vmem>>, vector<1x32xf32>
    %239 = vector.broadcast %238 : vector<1x32xf32> to vector<8x32xf32>
    %240 = arith.addf %237, %239 : vector<8x32xf32>
    %cst_66 = arith.constant 0.000000e+00 : f32
    %241 = vector.broadcast %cst_66 : f32 to vector<8x32xf32>
    %242 = arith.maximumf %240, %241 : vector<8x32xf32>
    %243 = vector.extract_strided_slice %15 {offsets = [0, 0], sizes = [1, 32], strides = [1, 1]} : vector<9x32xf32> to vector<1x32xf32>
    %244 = vector.broadcast %243 : vector<1x32xf32> to vector<8x32xf32>
    %245 = arith.mulf %242, %244 : vector<8x32xf32>
    %246 = vector.extract_strided_slice %16 {offsets = [0, 0], sizes = [1, 32], strides = [1, 1]} : vector<9x32xf32> to vector<1x32xf32>
    %247 = vector.broadcast %246 : vector<1x32xf32> to vector<8x32xf32>
    %248 = arith.addf %245, %247 : vector<8x32xf32>
    %cst_67 = arith.constant 0.000000e+00 : f32
    %249 = vector.broadcast %cst_67 : f32 to vector<8x32xf32>
    %250 = arith.maximumf %248, %249 : vector<8x32xf32>
    %251 = vector.extract_strided_slice %15 {offsets = [1, 0], sizes = [1, 32], strides = [1, 1]} : vector<9x32xf32> to vector<1x32xf32>
    %252 = vector.broadcast %251 : vector<1x32xf32> to vector<8x32xf32>
    %253 = arith.mulf %242, %252 : vector<8x32xf32>
    %254 = vector.extract_strided_slice %16 {offsets = [1, 0], sizes = [1, 32], strides = [1, 1]} : vector<9x32xf32> to vector<1x32xf32>
    %255 = vector.broadcast %254 : vector<1x32xf32> to vector<8x32xf32>
    %256 = arith.addf %253, %255 : vector<8x32xf32>
    %cst_68 = arith.constant 0.000000e+00 : f32
    %257 = vector.broadcast %cst_68 : f32 to vector<8x32xf32>
    %258 = arith.maximumf %256, %257 : vector<8x32xf32>
    %259 = vector.extract_strided_slice %15 {offsets = [2, 0], sizes = [1, 32], strides = [1, 1]} : vector<9x32xf32> to vector<1x32xf32>
    %260 = vector.broadcast %259 : vector<1x32xf32> to vector<8x32xf32>
    %261 = arith.mulf %242, %260 : vector<8x32xf32>
    %262 = vector.extract_strided_slice %16 {offsets = [2, 0], sizes = [1, 32], strides = [1, 1]} : vector<9x32xf32> to vector<1x32xf32>
    %263 = vector.broadcast %262 : vector<1x32xf32> to vector<8x32xf32>
    %264 = arith.addf %261, %263 : vector<8x32xf32>
    %cst_69 = arith.constant 0.000000e+00 : f32
    %265 = vector.broadcast %cst_69 : f32 to vector<8x32xf32>
    %266 = arith.maximumf %264, %265 : vector<8x32xf32>
    %267 = vector.extract_strided_slice %15 {offsets = [3, 0], sizes = [1, 32], strides = [1, 1]} : vector<9x32xf32> to vector<1x32xf32>
    %268 = vector.broadcast %267 : vector<1x32xf32> to vector<8x32xf32>
    %269 = arith.mulf %242, %268 : vector<8x32xf32>
    %270 = vector.extract_strided_slice %16 {offsets = [3, 0], sizes = [1, 32], strides = [1, 1]} : vector<9x32xf32> to vector<1x32xf32>
    %271 = vector.broadcast %270 : vector<1x32xf32> to vector<8x32xf32>
    %272 = arith.addf %269, %271 : vector<8x32xf32>
    %cst_70 = arith.constant 0.000000e+00 : f32
    %273 = vector.broadcast %cst_70 : f32 to vector<8x32xf32>
    %274 = arith.maximumf %272, %273 : vector<8x32xf32>
    %275 = vector.extract_strided_slice %15 {offsets = [4, 0], sizes = [1, 32], strides = [1, 1]} : vector<9x32xf32> to vector<1x32xf32>
    %276 = vector.broadcast %275 : vector<1x32xf32> to vector<8x32xf32>
    %277 = arith.mulf %242, %276 : vector<8x32xf32>
    %278 = vector.extract_strided_slice %16 {offsets = [4, 0], sizes = [1, 32], strides = [1, 1]} : vector<9x32xf32> to vector<1x32xf32>
    %279 = vector.broadcast %278 : vector<1x32xf32> to vector<8x32xf32>
    %280 = arith.addf %277, %279 : vector<8x32xf32>
    %cst_71 = arith.constant 0.000000e+00 : f32
    %281 = vector.broadcast %cst_71 : f32 to vector<8x32xf32>
    %282 = arith.maximumf %280, %281 : vector<8x32xf32>
    %283 = vector.extract_strided_slice %15 {offsets = [5, 0], sizes = [1, 32], strides = [1, 1]} : vector<9x32xf32> to vector<1x32xf32>
    %284 = vector.broadcast %283 : vector<1x32xf32> to vector<8x32xf32>
    %285 = arith.mulf %242, %284 : vector<8x32xf32>
    %286 = vector.extract_strided_slice %16 {offsets = [5, 0], sizes = [1, 32], strides = [1, 1]} : vector<9x32xf32> to vector<1x32xf32>
    %287 = vector.broadcast %286 : vector<1x32xf32> to vector<8x32xf32>
    %288 = arith.addf %285, %287 : vector<8x32xf32>
    %cst_72 = arith.constant 0.000000e+00 : f32
    %289 = vector.broadcast %cst_72 : f32 to vector<8x32xf32>
    %290 = arith.maximumf %288, %289 : vector<8x32xf32>
    %291 = vector.extract_strided_slice %15 {offsets = [6, 0], sizes = [1, 32], strides = [1, 1]} : vector<9x32xf32> to vector<1x32xf32>
    %292 = vector.broadcast %291 : vector<1x32xf32> to vector<8x32xf32>
    %293 = arith.mulf %242, %292 : vector<8x32xf32>
    %294 = vector.extract_strided_slice %16 {offsets = [6, 0], sizes = [1, 32], strides = [1, 1]} : vector<9x32xf32> to vector<1x32xf32>
    %295 = vector.broadcast %294 : vector<1x32xf32> to vector<8x32xf32>
    %296 = arith.addf %293, %295 : vector<8x32xf32>
    %cst_73 = arith.constant 0.000000e+00 : f32
    %297 = vector.broadcast %cst_73 : f32 to vector<8x32xf32>
    %298 = arith.maximumf %296, %297 : vector<8x32xf32>
    %299 = vector.extract_strided_slice %15 {offsets = [7, 0], sizes = [1, 32], strides = [1, 1]} : vector<9x32xf32> to vector<1x32xf32>
    %300 = vector.broadcast %299 : vector<1x32xf32> to vector<8x32xf32>
    %301 = arith.mulf %242, %300 : vector<8x32xf32>
    %302 = vector.extract_strided_slice %16 {offsets = [7, 0], sizes = [1, 32], strides = [1, 1]} : vector<9x32xf32> to vector<1x32xf32>
    %303 = vector.broadcast %302 : vector<1x32xf32> to vector<8x32xf32>
    %304 = arith.addf %301, %303 : vector<8x32xf32>
    %cst_74 = arith.constant 0.000000e+00 : f32
    %305 = vector.broadcast %cst_74 : f32 to vector<8x32xf32>
    %306 = arith.maximumf %304, %305 : vector<8x32xf32>
    %307 = vector.extract_strided_slice %15 {offsets = [8, 0], sizes = [1, 32], strides = [1, 1]} : vector<9x32xf32> to vector<1x32xf32>
    %308 = vector.broadcast %307 : vector<1x32xf32> to vector<8x32xf32>
    %309 = arith.mulf %242, %308 : vector<8x32xf32>
    %310 = vector.extract_strided_slice %16 {offsets = [8, 0], sizes = [1, 32], strides = [1, 1]} : vector<9x32xf32> to vector<1x32xf32>
    %311 = vector.broadcast %310 : vector<1x32xf32> to vector<8x32xf32>
    %312 = arith.addf %309, %311 : vector<8x32xf32>
    %cst_75 = arith.constant 0.000000e+00 : f32
    %313 = vector.broadcast %cst_75 : f32 to vector<8x32xf32>
    %314 = arith.maximumf %312, %313 : vector<8x32xf32>
    %315 = arith.addf %250, %258 : vector<8x32xf32>
    %316 = arith.addf %315, %266 : vector<8x32xf32>
    %cst_76 = arith.constant 0.333333343 : f32
    %317 = vector.broadcast %cst_76 : f32 to vector<8x32xf32>
    %318 = arith.mulf %316, %317 : vector<8x32xf32>
    %319 = arith.addf %274, %282 : vector<8x32xf32>
    %320 = arith.addf %319, %290 : vector<8x32xf32>
    %cst_77 = arith.constant 0.333333343 : f32
    %321 = vector.broadcast %cst_77 : f32 to vector<8x32xf32>
    %322 = arith.mulf %320, %321 : vector<8x32xf32>
    %323 = arith.addf %298, %306 : vector<8x32xf32>
    %324 = arith.addf %323, %314 : vector<8x32xf32>
    %cst_78 = arith.constant 0.333333343 : f32
    %325 = vector.broadcast %cst_78 : f32 to vector<8x32xf32>
    %326 = arith.mulf %324, %325 : vector<8x32xf32>
    %327 = arith.addf %250, %274 : vector<8x32xf32>
    %328 = arith.addf %327, %298 : vector<8x32xf32>
    %cst_79 = arith.constant 0.333333343 : f32
    %329 = vector.broadcast %cst_79 : f32 to vector<8x32xf32>
    %330 = arith.mulf %328, %329 : vector<8x32xf32>
    %331 = arith.addf %258, %282 : vector<8x32xf32>
    %332 = arith.addf %331, %306 : vector<8x32xf32>
    %cst_80 = arith.constant 0.333333343 : f32
    %333 = vector.broadcast %cst_80 : f32 to vector<8x32xf32>
    %334 = arith.mulf %332, %333 : vector<8x32xf32>
    %335 = arith.addf %266, %290 : vector<8x32xf32>
    %336 = arith.addf %335, %314 : vector<8x32xf32>
    %cst_81 = arith.constant 0.333333343 : f32
    %337 = vector.broadcast %cst_81 : f32 to vector<8x32xf32>
    %338 = arith.mulf %336, %337 : vector<8x32xf32>
    %339 = tpu.concatenate %318, %322, %326, %330, %334, %338 in 0 : vector<8x32xf32>, vector<8x32xf32>, vector<8x32xf32>, vector<8x32xf32>, vector<8x32xf32>, vector<8x32xf32> -> vector<48x32xf32>
    %340 = arith.truncf %339 : vector<48x32xf32> to vector<48x32xbf16>
    %cst_82 = arith.constant dense<0.000000e+00> : vector<48x32xf32>
    %341 = tpu.matmul %340, %17, %cst_82 {dimension_numbers = #tpu.dot_dimension_numbers<[1], [0], [0], [1], [0, 0, 1, 1], [], []>} : vector<48x32xbf16>, vector<32x32xbf16>, vector<48x32xf32> -> vector<48x32xf32>
    %342 = vector.broadcast %18 : vector<1x32xf32> to vector<48x32xf32>
    %343 = arith.addf %341, %342 : vector<48x32xf32>
    %cst_83 = arith.constant 3.000000e+00 : f32
    %344 = vector.broadcast %cst_83 : f32 to vector<48x32xf32>
    %345 = arith.addf %343, %344 : vector<48x32xf32>
    %cst_84 = arith.constant 0.000000e+00 : f32
    %cst_85 = arith.constant 6.000000e+00 : f32
    %346 = vector.broadcast %cst_84 : f32 to vector<48x32xf32>
    %347 = arith.maximumf %346, %345 : vector<48x32xf32>
    %348 = vector.broadcast %cst_85 : f32 to vector<48x32xf32>
    %349 = arith.minimumf %348, %347 : vector<48x32xf32>
    %350 = arith.mulf %343, %349 : vector<48x32xf32>
    %cst_86 = arith.constant 0.166666672 : f32
    %351 = vector.broadcast %cst_86 : f32 to vector<48x32xf32>
    %352 = arith.mulf %350, %351 : vector<48x32xf32>
    %353 = arith.truncf %352 : vector<48x32xf32> to vector<48x32xbf16>
    %cst_87 = arith.constant dense<0.000000e+00> : vector<48x128xf32>
    %354 = tpu.matmul %353, %19, %cst_87 {dimension_numbers = #tpu.dot_dimension_numbers<[1], [0], [0], [1], [0, 0, 1, 1], [], []>} : vector<48x32xbf16>, vector<32x128xbf16>, vector<48x128xf32> -> vector<48x128xf32>
    %355 = vector.broadcast %20 : vector<1x128xf32> to vector<48x128xf32>
    %356 = arith.addf %354, %355 : vector<48x128xf32>
    %357 = vector.extract_strided_slice %356 {offsets = [0, 0], sizes = [24, 32], strides = [1, 1]} : vector<48x128xf32> to vector<24x32xf32>
    %cst_88 = arith.constant 0.000000e+00 : f32
    %358 = vector.broadcast %cst_88 : f32 to vector<24x32xf32>
    %359 = arith.subf %358, %357 : vector<24x32xf32>
    %360 = math.exp %359 : vector<24x32xf32>
    %cst_89 = arith.constant 1.000000e+00 : f32
    %361 = vector.broadcast %cst_89 : f32 to vector<24x32xf32>
    %362 = arith.addf %361, %360 : vector<24x32xf32>
    %363 = tpu.reciprocal %362 {approx = true} : vector<24x32xf32> -> vector<24x32xf32>
    %364 = vector.extract_strided_slice %356 {offsets = [24, 32], sizes = [24, 32], strides = [1, 1]} : vector<48x128xf32> to vector<24x32xf32>
    %cst_90 = arith.constant 0.000000e+00 : f32
    %365 = vector.broadcast %cst_90 : f32 to vector<24x32xf32>
    %366 = arith.subf %365, %364 : vector<24x32xf32>
    %367 = math.exp %366 : vector<24x32xf32>
    %cst_91 = arith.constant 1.000000e+00 : f32
    %368 = vector.broadcast %cst_91 : f32 to vector<24x32xf32>
    %369 = arith.addf %368, %367 : vector<24x32xf32>
    %370 = tpu.reciprocal %369 {approx = true} : vector<24x32xf32> -> vector<24x32xf32>
    %371 = vector.extract_strided_slice %363 {offsets = [0, 0], sizes = [8, 32], strides = [1, 1]} : vector<24x32xf32> to vector<8x32xf32>
    %372 = arith.mulf %250, %371 : vector<8x32xf32>
    %373 = vector.extract_strided_slice %370 {offsets = [0, 0], sizes = [8, 32], strides = [1, 1]} : vector<24x32xf32> to vector<8x32xf32>
    %374 = arith.mulf %372, %373 : vector<8x32xf32>
    %375 = vector.extract_strided_slice %363 {offsets = [0, 0], sizes = [8, 32], strides = [1, 1]} : vector<24x32xf32> to vector<8x32xf32>
    %376 = arith.mulf %258, %375 : vector<8x32xf32>
    %377 = vector.extract_strided_slice %370 {offsets = [8, 0], sizes = [8, 32], strides = [1, 1]} : vector<24x32xf32> to vector<8x32xf32>
    %378 = arith.mulf %376, %377 : vector<8x32xf32>
    %379 = vector.extract_strided_slice %363 {offsets = [0, 0], sizes = [8, 32], strides = [1, 1]} : vector<24x32xf32> to vector<8x32xf32>
    %380 = arith.mulf %266, %379 : vector<8x32xf32>
    %381 = vector.extract_strided_slice %370 {offsets = [16, 0], sizes = [8, 32], strides = [1, 1]} : vector<24x32xf32> to vector<8x32xf32>
    %382 = arith.mulf %380, %381 : vector<8x32xf32>
    %383 = vector.extract_strided_slice %363 {offsets = [8, 0], sizes = [8, 32], strides = [1, 1]} : vector<24x32xf32> to vector<8x32xf32>
    %384 = arith.mulf %274, %383 : vector<8x32xf32>
    %385 = vector.extract_strided_slice %370 {offsets = [0, 0], sizes = [8, 32], strides = [1, 1]} : vector<24x32xf32> to vector<8x32xf32>
    %386 = arith.mulf %384, %385 : vector<8x32xf32>
    %387 = vector.extract_strided_slice %363 {offsets = [8, 0], sizes = [8, 32], strides = [1, 1]} : vector<24x32xf32> to vector<8x32xf32>
    %388 = arith.mulf %282, %387 : vector<8x32xf32>
    %389 = vector.extract_strided_slice %370 {offsets = [8, 0], sizes = [8, 32], strides = [1, 1]} : vector<24x32xf32> to vector<8x32xf32>
    %390 = arith.mulf %388, %389 : vector<8x32xf32>
    %391 = vector.extract_strided_slice %363 {offsets = [8, 0], sizes = [8, 32], strides = [1, 1]} : vector<24x32xf32> to vector<8x32xf32>
    %392 = arith.mulf %290, %391 : vector<8x32xf32>
    %393 = vector.extract_strided_slice %370 {offsets = [16, 0], sizes = [8, 32], strides = [1, 1]} : vector<24x32xf32> to vector<8x32xf32>
    %394 = arith.mulf %392, %393 : vector<8x32xf32>
    %395 = vector.extract_strided_slice %363 {offsets = [16, 0], sizes = [8, 32], strides = [1, 1]} : vector<24x32xf32> to vector<8x32xf32>
    %396 = arith.mulf %298, %395 : vector<8x32xf32>
    %397 = vector.extract_strided_slice %370 {offsets = [0, 0], sizes = [8, 32], strides = [1, 1]} : vector<24x32xf32> to vector<8x32xf32>
    %398 = arith.mulf %396, %397 : vector<8x32xf32>
    %399 = vector.extract_strided_slice %363 {offsets = [16, 0], sizes = [8, 32], strides = [1, 1]} : vector<24x32xf32> to vector<8x32xf32>
    %400 = arith.mulf %306, %399 : vector<8x32xf32>
    %401 = vector.extract_strided_slice %370 {offsets = [8, 0], sizes = [8, 32], strides = [1, 1]} : vector<24x32xf32> to vector<8x32xf32>
    %402 = arith.mulf %400, %401 : vector<8x32xf32>
    %403 = vector.extract_strided_slice %363 {offsets = [16, 0], sizes = [8, 32], strides = [1, 1]} : vector<24x32xf32> to vector<8x32xf32>
    %404 = arith.mulf %314, %403 : vector<8x32xf32>
    %405 = vector.extract_strided_slice %370 {offsets = [16, 0], sizes = [8, 32], strides = [1, 1]} : vector<24x32xf32> to vector<8x32xf32>
    %406 = arith.mulf %404, %405 : vector<8x32xf32>
    %407 = tpu.concatenate %374, %378, %382, %386, %390, %394, %398, %402, %406 in 1 : vector<8x32xf32>, vector<8x32xf32>, vector<8x32xf32>, vector<8x32xf32>, vector<8x32xf32>, vector<8x32xf32>, vector<8x32xf32>, vector<8x32xf32>, vector<8x32xf32> -> vector<8x288xf32>
    %408 = arith.truncf %407 : vector<8x288xf32> to vector<8x288xbf16>
    %cst_92 = arith.constant dense<0.000000e+00> : vector<8x32xf32>
    %409 = tpu.matmul %408, %21, %cst_92 {dimension_numbers = #tpu.dot_dimension_numbers<[1], [0], [0], [1], [0, 0, 1, 1], [], []>} : vector<8x288xbf16>, vector<288x32xbf16>, vector<8x32xf32> -> vector<8x32xf32>
    %410 = vector.broadcast %22 : vector<1x32xf32> to vector<8x32xf32>
    %411 = arith.addf %409, %410 : vector<8x32xf32>
    %cst_93 = arith.constant 0.000000e+00 : f32
    %412 = vector.broadcast %cst_93 : f32 to vector<8x32xf32>
    %413 = arith.maximumf %411, %412 : vector<8x32xf32>
    %c32_94 = arith.constant 32 : index
    %c0_95 = arith.constant 0 : index
    %414 = vector.load %arg4[%c32_94, %c0_95] : memref<192x128xbf16, #tpu.memory_space<vmem>>, vector<32x128xbf16>
    %c8_96 = arith.constant 8 : index
    %c0_97 = arith.constant 0 : index
    %415 = vector.load %arg6[%c8_96, %c0_97] : memref<24x128xf32, #tpu.memory_space<vmem>>, vector<1x128xf32>
    %416 = arith.truncf %413 : vector<8x32xf32> to vector<8x32xbf16>
    %cst_98 = arith.constant dense<0.000000e+00> : vector<8x128xf32>
    %417 = tpu.matmul %416, %414, %cst_98 {dimension_numbers = #tpu.dot_dimension_numbers<[1], [0], [0], [1], [0, 0, 1, 1], [], []>} : vector<8x32xbf16>, vector<32x128xbf16>, vector<8x128xf32> -> vector<8x128xf32>
    %418 = vector.broadcast %415 : vector<1x128xf32> to vector<8x128xf32>
    %419 = arith.addf %417, %418 : vector<8x128xf32>
    %420 = vector.extract_strided_slice %419 {offsets = [0, 0], sizes = [8, 32], strides = [1, 1]} : vector<8x128xf32> to vector<8x32xf32>
    %cst_99 = arith.constant 0.000000e+00 : f32
    %421 = vector.broadcast %cst_99 : f32 to vector<8x32xf32>
    %422 = arith.subf %421, %420 : vector<8x32xf32>
    %423 = math.exp %422 : vector<8x32xf32>
    %cst_100 = arith.constant 1.000000e+00 : f32
    %424 = vector.broadcast %cst_100 : f32 to vector<8x32xf32>
    %425 = arith.addf %424, %423 : vector<8x32xf32>
    %426 = tpu.reciprocal %425 {approx = true} : vector<8x32xf32> -> vector<8x32xf32>
    %427 = vector.extract_strided_slice %419 {offsets = [0, 32], sizes = [8, 32], strides = [1, 1]} : vector<8x128xf32> to vector<8x32xf32>
    %428 = math.tanh %427 : vector<8x32xf32>
    %429 = vector.extract_strided_slice %419 {offsets = [0, 64], sizes = [8, 32], strides = [1, 1]} : vector<8x128xf32> to vector<8x32xf32>
    %cst_101 = arith.constant 0.000000e+00 : f32
    %430 = vector.broadcast %cst_101 : f32 to vector<8x32xf32>
    %431 = arith.subf %430, %429 : vector<8x32xf32>
    %432 = math.exp %431 : vector<8x32xf32>
    %cst_102 = arith.constant 1.000000e+00 : f32
    %433 = vector.broadcast %cst_102 : f32 to vector<8x32xf32>
    %434 = arith.addf %433, %432 : vector<8x32xf32>
    %435 = tpu.reciprocal %434 {approx = true} : vector<8x32xf32> -> vector<8x32xf32>
    %436 = arith.mulf %426, %428 : vector<8x32xf32>
    %437 = math.tanh %436 : vector<8x32xf32>
    %438 = arith.mulf %435, %437 : vector<8x32xf32>
    %c64_103 = arith.constant 64 : index
    %c0_104 = arith.constant 0 : index
    %439 = vector.load %arg4[%c64_103, %c0_104] : memref<192x128xbf16, #tpu.memory_space<vmem>>, vector<32x128xbf16>
    %c9 = arith.constant 9 : index
    %c0_105 = arith.constant 0 : index
    %440 = vector.load %arg6[%c9, %c0_105] : memref<24x128xf32, #tpu.memory_space<vmem>>, vector<1x128xf32>
    %441 = arith.truncf %438 : vector<8x32xf32> to vector<8x32xbf16>
    %cst_106 = arith.constant dense<0.000000e+00> : vector<8x128xf32>
    %442 = tpu.matmul %441, %439, %cst_106 {dimension_numbers = #tpu.dot_dimension_numbers<[1], [0], [0], [1], [0, 0, 1, 1], [], []>} : vector<8x32xbf16>, vector<32x128xbf16>, vector<8x128xf32> -> vector<8x128xf32>
    %443 = vector.broadcast %440 : vector<1x128xf32> to vector<8x128xf32>
    %444 = arith.addf %442, %443 : vector<8x128xf32>
    %445 = vector.extract_strided_slice %444 {offsets = [0, 0], sizes = [8, 32], strides = [1, 1]} : vector<8x128xf32> to vector<8x32xf32>
    %cst_107 = arith.constant 0.000000e+00 : f32
    %446 = vector.broadcast %cst_107 : f32 to vector<8x32xf32>
    %447 = arith.subf %446, %445 : vector<8x32xf32>
    %448 = math.exp %447 : vector<8x32xf32>
    %cst_108 = arith.constant 1.000000e+00 : f32
    %449 = vector.broadcast %cst_108 : f32 to vector<8x32xf32>
    %450 = arith.addf %449, %448 : vector<8x32xf32>
    %451 = tpu.reciprocal %450 {approx = true} : vector<8x32xf32> -> vector<8x32xf32>
    %452 = vector.extract_strided_slice %444 {offsets = [0, 32], sizes = [8, 32], strides = [1, 1]} : vector<8x128xf32> to vector<8x32xf32>
    %453 = math.tanh %452 : vector<8x32xf32>
    %454 = vector.extract_strided_slice %444 {offsets = [0, 64], sizes = [8, 32], strides = [1, 1]} : vector<8x128xf32> to vector<8x32xf32>
    %cst_109 = arith.constant 0.000000e+00 : f32
    %455 = vector.broadcast %cst_109 : f32 to vector<8x32xf32>
    %456 = arith.subf %455, %454 : vector<8x32xf32>
    %457 = math.exp %456 : vector<8x32xf32>
    %cst_110 = arith.constant 1.000000e+00 : f32
    %458 = vector.broadcast %cst_110 : f32 to vector<8x32xf32>
    %459 = arith.addf %458, %457 : vector<8x32xf32>
    %460 = tpu.reciprocal %459 {approx = true} : vector<8x32xf32> -> vector<8x32xf32>
    %461 = arith.mulf %451, %453 : vector<8x32xf32>
    %462 = math.tanh %461 : vector<8x32xf32>
    %463 = arith.mulf %460, %462 : vector<8x32xf32>
    %c96 = arith.constant 96 : index
    %c0_111 = arith.constant 0 : index
    %464 = vector.load %arg4[%c96, %c0_111] : memref<192x128xbf16, #tpu.memory_space<vmem>>, vector<32x128xbf16>
    %c10 = arith.constant 10 : index
    %c0_112 = arith.constant 0 : index
    %465 = vector.load %arg6[%c10, %c0_112] : memref<24x128xf32, #tpu.memory_space<vmem>>, vector<1x128xf32>
    %466 = arith.truncf %463 : vector<8x32xf32> to vector<8x32xbf16>
    %cst_113 = arith.constant dense<0.000000e+00> : vector<8x128xf32>
    %467 = tpu.matmul %466, %464, %cst_113 {dimension_numbers = #tpu.dot_dimension_numbers<[1], [0], [0], [1], [0, 0, 1, 1], [], []>} : vector<8x32xbf16>, vector<32x128xbf16>, vector<8x128xf32> -> vector<8x128xf32>
    %468 = vector.broadcast %465 : vector<1x128xf32> to vector<8x128xf32>
    %469 = arith.addf %467, %468 : vector<8x128xf32>
    %470 = vector.extract_strided_slice %469 {offsets = [0, 0], sizes = [8, 32], strides = [1, 1]} : vector<8x128xf32> to vector<8x32xf32>
    %cst_114 = arith.constant 0.000000e+00 : f32
    %471 = vector.broadcast %cst_114 : f32 to vector<8x32xf32>
    %472 = arith.subf %471, %470 : vector<8x32xf32>
    %473 = math.exp %472 : vector<8x32xf32>
    %cst_115 = arith.constant 1.000000e+00 : f32
    %474 = vector.broadcast %cst_115 : f32 to vector<8x32xf32>
    %475 = arith.addf %474, %473 : vector<8x32xf32>
    %476 = tpu.reciprocal %475 {approx = true} : vector<8x32xf32> -> vector<8x32xf32>
    %477 = vector.extract_strided_slice %469 {offsets = [0, 32], sizes = [8, 32], strides = [1, 1]} : vector<8x128xf32> to vector<8x32xf32>
    %478 = math.tanh %477 : vector<8x32xf32>
    %479 = vector.extract_strided_slice %469 {offsets = [0, 64], sizes = [8, 32], strides = [1, 1]} : vector<8x128xf32> to vector<8x32xf32>
    %cst_116 = arith.constant 0.000000e+00 : f32
    %480 = vector.broadcast %cst_116 : f32 to vector<8x32xf32>
    %481 = arith.subf %480, %479 : vector<8x32xf32>
    %482 = math.exp %481 : vector<8x32xf32>
    %cst_117 = arith.constant 1.000000e+00 : f32
    %483 = vector.broadcast %cst_117 : f32 to vector<8x32xf32>
    %484 = arith.addf %483, %482 : vector<8x32xf32>
    %485 = tpu.reciprocal %484 {approx = true} : vector<8x32xf32> -> vector<8x32xf32>
    %486 = arith.mulf %476, %478 : vector<8x32xf32>
    %487 = math.tanh %486 : vector<8x32xf32>
    %488 = arith.mulf %485, %487 : vector<8x32xf32>
    %c128 = arith.constant 128 : index
    %c0_118 = arith.constant 0 : index
    %489 = vector.load %arg4[%c128, %c0_118] : memref<192x128xbf16, #tpu.memory_space<vmem>>, vector<32x128xbf16>
    %c11 = arith.constant 11 : index
    %c0_119 = arith.constant 0 : index
    %490 = vector.load %arg6[%c11, %c0_119] : memref<24x128xf32, #tpu.memory_space<vmem>>, vector<1x128xf32>
    %491 = arith.truncf %488 : vector<8x32xf32> to vector<8x32xbf16>
    %cst_120 = arith.constant dense<0.000000e+00> : vector<8x128xf32>
    %492 = tpu.matmul %491, %489, %cst_120 {dimension_numbers = #tpu.dot_dimension_numbers<[1], [0], [0], [1], [0, 0, 1, 1], [], []>} : vector<8x32xbf16>, vector<32x128xbf16>, vector<8x128xf32> -> vector<8x128xf32>
    %493 = vector.broadcast %490 : vector<1x128xf32> to vector<8x128xf32>
    %494 = arith.addf %492, %493 : vector<8x128xf32>
    %495 = vector.extract_strided_slice %494 {offsets = [0, 0], sizes = [8, 32], strides = [1, 1]} : vector<8x128xf32> to vector<8x32xf32>
    %cst_121 = arith.constant 0.000000e+00 : f32
    %496 = vector.broadcast %cst_121 : f32 to vector<8x32xf32>
    %497 = arith.subf %496, %495 : vector<8x32xf32>
    %498 = math.exp %497 : vector<8x32xf32>
    %cst_122 = arith.constant 1.000000e+00 : f32
    %499 = vector.broadcast %cst_122 : f32 to vector<8x32xf32>
    %500 = arith.addf %499, %498 : vector<8x32xf32>
    %501 = tpu.reciprocal %500 {approx = true} : vector<8x32xf32> -> vector<8x32xf32>
    %502 = vector.extract_strided_slice %494 {offsets = [0, 32], sizes = [8, 32], strides = [1, 1]} : vector<8x128xf32> to vector<8x32xf32>
    %503 = math.tanh %502 : vector<8x32xf32>
    %504 = vector.extract_strided_slice %494 {offsets = [0, 64], sizes = [8, 32], strides = [1, 1]} : vector<8x128xf32> to vector<8x32xf32>
    %cst_123 = arith.constant 0.000000e+00 : f32
    %505 = vector.broadcast %cst_123 : f32 to vector<8x32xf32>
    %506 = arith.subf %505, %504 : vector<8x32xf32>
    %507 = math.exp %506 : vector<8x32xf32>
    %cst_124 = arith.constant 1.000000e+00 : f32
    %508 = vector.broadcast %cst_124 : f32 to vector<8x32xf32>
    %509 = arith.addf %508, %507 : vector<8x32xf32>
    %510 = tpu.reciprocal %509 {approx = true} : vector<8x32xf32> -> vector<8x32xf32>
    %511 = arith.mulf %501, %503 : vector<8x32xf32>
    %512 = math.tanh %511 : vector<8x32xf32>
    %513 = arith.mulf %510, %512 : vector<8x32xf32>
    %514 = arith.truncf %513 : vector<8x32xf32> to vector<8x32xbf16>
    %c384 = arith.constant 384 : index
    %c0_125 = arith.constant 0 : index
    %515 = vector.load %arg3[%c384, %c0_125] : memref<416x32xbf16, #tpu.memory_space<vmem>>, vector<32x32xbf16>
    %cst_126 = arith.constant dense<0.000000e+00> : vector<8x32xf32>
    %516 = tpu.matmul %514, %515, %cst_126 {dimension_numbers = #tpu.dot_dimension_numbers<[1], [0], [0], [1], [0, 0, 1, 1], [], []>} : vector<8x32xbf16>, vector<32x32xbf16>, vector<8x32xf32> -> vector<8x32xf32>
    %c96_127 = arith.constant 96 : index
    %c0_128 = arith.constant 0 : index
    %517 = vector.load %arg5[%c96_127, %c0_128] : memref<104x32xf32, #tpu.memory_space<vmem>>, vector<1x32xf32>
    %518 = vector.broadcast %517 : vector<1x32xf32> to vector<8x32xf32>
    %519 = arith.addf %516, %518 : vector<8x32xf32>
    %cst_129 = arith.constant 0.000000e+00 : f32
    %520 = vector.broadcast %cst_129 : f32 to vector<8x32xf32>
    %521 = arith.maximumf %519, %520 : vector<8x32xf32>
    %522 = arith.truncf %521 : vector<8x32xf32> to vector<8x32xbf16>
    %c160 = arith.constant 160 : index
    %c0_130 = arith.constant 0 : index
    %523 = vector.load %arg4[%c160, %c0_130] : memref<192x128xbf16, #tpu.memory_space<vmem>>, vector<32x128xbf16>
    %cst_131 = arith.constant dense<0.000000e+00> : vector<8x128xf32>
    %524 = tpu.matmul %522, %523, %cst_131 {dimension_numbers = #tpu.dot_dimension_numbers<[1], [0], [0], [1], [0, 0, 1, 1], [], []>} : vector<8x32xbf16>, vector<32x128xbf16>, vector<8x128xf32> -> vector<8x128xf32>
    %c16_132 = arith.constant 16 : index
    %c0_133 = arith.constant 0 : index
    %525 = vector.load %arg6[%c16_132, %c0_133] : memref<24x128xf32, #tpu.memory_space<vmem>>, vector<1x128xf32>
    %526 = vector.broadcast %525 : vector<1x128xf32> to vector<8x128xf32>
    %527 = arith.addf %524, %526 : vector<8x128xf32>
    %cst_134 = arith.constant dense<0xFF800000> : vector<8xf32>
    %528 = vector.multi_reduction <maximumf>, %527, %cst_134 [1] : vector<8x128xf32> to vector<8xf32>
    %529 = vector.shape_cast %528 : vector<8xf32> to vector<8x1xf32>
    %530 = vector.broadcast %529 : vector<8x1xf32> to vector<8x128xf32>
    %531 = arith.subf %527, %530 : vector<8x128xf32>
    %532 = math.exp %531 : vector<8x128xf32>
    %cst_135 = arith.constant dense<0.000000e+00> : vector<8xf32>
    %533 = vector.multi_reduction <add>, %532, %cst_135 [1] : vector<8x128xf32> to vector<8xf32>
    %534 = vector.shape_cast %533 : vector<8xf32> to vector<8x1xf32>
    %535 = math.log %534 : vector<8x1xf32>
    %536 = arith.addf %529, %535 : vector<8x1xf32>
    %537 = vector.broadcast %536 : vector<8x1xf32> to vector<8x128xf32>
    %538 = arith.subf %527, %537 : vector<8x128xf32>
    %c0_136 = arith.constant 0 : index
    %c0_137 = arith.constant 0 : index
    %539 = vector.load %arg7[%c0_136, %c0_137] : memref<8x128xf32, #tpu.memory_space<vmem>>, vector<8x128xf32>
    tpu.vector_store %arg7[%c0_136, %c0_137], %538 {strides = array<i32>} : memref<8x128xf32, #tpu.memory_space<vmem>>, vector<8x128xf32>,
    return
  }
}

</mosaic_0001>

<bundles_post_ra>
// kernel: mul.1
= control target key start
LH: loop header
LB: loop body
LE: loop exit
PB: predicated region body
PF: predicated region fallthrough
CT: control target
= control target key end

     0   :  { %s34_s0 = inlined_call_operand.vmem [shape: f32[24], index: 0, kind: input, shape index: {}]   ;;  %s35_s1 = inlined_call_operand.vmem [shape: f32[24], index: 1, kind: input, shape index: {}]   ;;  %s36_s2 = inlined_call_operand.vmem [shape: f32[24], index: 2, kind: output, shape index: {}]  }
   0x1   :  { %v3_v0 = vld [vmem:[%s34_s0] sm:$0x1] }
   0x2   :  { %v4_v1 = vld [vmem:[%s35_s1] sm:$0x1] }
   0x3   :  { %v7_v2 = vmul.f32 %v4_v1, %v3_v0 }
   0x5   :  { %9 = vst [vmem:[%s36_s2] sm:$0x1] %v7_v2 }

// kernel: _lambda_.1
= control target key start
LH: loop header
LB: loop body
LE: loop exit
PB: predicated region body
PF: predicated region fallthrough
CT: control target
= control target key end

     0   :  { %v3050_v0 = vmov 0.0   ;;  %vm2375_vm0 = vmmov 0   ;;  %vm50_vm1 = vcmask 261120   ;;  %vm105_vm2 = vcmask 1043456   ;;  %s2376_s16 = smov 96   ;;  %s2377_s19 = smov 32   ;;  %s3042_s3 = inlined_call_operand.vmem [shape: bf16[416,32], index: 3, kind: input, shape index: {}]   ;;  %s3043_s2 = inlined_call_operand.vmem [shape: f32[8,32], index: 2, kind: input, shape index: {}]   ;;  %s3044_s5 = inlined_call_operand.vmem [shape: f32[104,32], index: 5, kind: input, shape index: {}]   ;;  %s3045_s0 = inlined_call_operand.vmem [shape: bf16[8,8], index: 0, kind: input, shape index: {}]   ;;  %s3046_s4 = inlined_call_operand.vmem [shape: bf16[192,128], index: 4, kind: input, shape index: {}]   ;;  %s3047_s6 = inlined_call_operand.vmem [shape: f32[24,128], index: 6, kind: input, shape index: {}]   ;;  %s3048_s1 = inlined_call_operand.vmem [shape: f32[8,8], index: 1, kind: input, shape index: {}]   ;;  %s3049_s7 = inlined_call_operand.vmem [shape: f32[8,128], index: 7, kind: output, shape index: {}]  }
   0x1   :  { %2057 = vmatprep.subr.bf16.mxu0 %v3050_v0  ;;  %v2248_v1 = vld [vmem:[%s3042_s3] sm:$0xff]   ;;  %2061 = vmatprep.mubr.msk.bf16.mxu0 %vm2375_vm0, %v3050_v0  ;;  %v2249_v2 = vld [vmem:[%s3042_s3 + $0x8] sm:$0xff]   ;;  %vm101_vm3 = vcmask 64512   ;;  %v2453_v14 = vld [vmem:[%s3042_s3 + $0x10] sm:$0xff]   ;;  %v201_v16 = vlaneseq  ;;  %s2378_s20 = smov 64   ;;  %vm603_vm4 = vcmask 523264  }
   0x2   :  { %2065 = vmatprep.subr.bf16.mxu1 %v3050_v0  ;;  %2067 = vmatprep.mubr.msk.bf16.mxu1 %vm2375_vm0, %v3050_v0  ;;  %v27_v3 = vld [vmem:[%s3043_s2] sm:$0xff]  ;;  %v2459_v15 = vld [vmem:[%s3042_s3 + $0x18] sm:$0xff]   ;;  %v150_v20 = vld [vmem:[%s3044_s5 + $0x10] sm:$0xff]  ;;  %vm605_vm5 = vcmask 785408  }
   0x3   :  { %2058 = vmatpush3.bf16.msra.mxu0 %v2248_v1  ;;  %v28_v4 = vpack.c.bf16 %v27_v3, %v27_v3  ;;  %v1880_v5 = vld [vmem:[%s3044_s5] ss:$0 sm:$0xff]  ;;  %v202_v17 = vshrl.u32 %v201_v16, 7  ;;  %v1884_v24 = vld [vmem:[%s3044_s5 + $0x8] ss:$0 sm:$0xff] }
   0x4   :  { %2059 = vmatprep.subr.bf16.mxu0 %v3050_v0  ;;  %v94_v13 = vld [vmem:[%s3045_s0] sm:$0xf] }
   0x5   :  { %v2463_v18 = vsub.s32 0, %v202_v17  ;;  %v214_v19 = vsub.s32 1, %v202_v17  ;;  %v225_v21 = vsub.s32 2, %v202_v17  ;;  %v236_v22 = vsub.s32 3, %v202_v17  ;;  %v152_v28 = vld [vmem:[%s3044_s5 + $0x20] sm:$0xff] }
   0x6   :  { %v247_v23 = vsub.s32 4, %v202_v17  ;;  %v258_v25 = vsub.s32 5, %v202_v17  ;;  %v269_v26 = vsub.s32 6, %v202_v17  ;;  %v280_v27 = vsub.s32 7, %v202_v17 }
   0x7   :  { %2060 = vmatpush3.bf16.msra.mxu0 %v2249_v2  ;;  %v2475_v30 = vrot.slane %v150_v20, %v2463_v18  ;;  %v2477_v31 = vrot.slane %v150_v20, %v214_v19  ;;  %v2479_v34 = vrot.slane %v150_v20, %v225_v21  ;;  %v2481_v35 = vrot.slane %v150_v20, %v236_v22  ;;  %v2525_v2 = vld [vmem:[%s3044_s5 + $0x18] ss:$0 sm:$0xff] }
   0x8   :  { %2087 = vmatprep.subr.bf16.mxu0 %v3050_v0  ;;  %v2483_v36 = vrot.slane %v150_v20, %v247_v23  ;;  %v2486_v38 = vrot.slane %v152_v28, %v2463_v18  ;;  %v2488_v39 = vrot.slane %v150_v20, %v258_v25  ;;  %v2490_v40 = vrot.slane %v150_v20, %v269_v26 }
   0x9   :  { %v2492_v41 = vrot.slane %v150_v20, %v280_v27  ;;  %v2494_v44 = vrot.slane %v152_v28, %v214_v19  ;;  %v2496_v45 = vrot.slane %v152_v28, %v225_v21  ;;  %v2498_v46 = vrot.slane %v152_v28, %v236_v22 }
   0xa   :  { %2062 = vmatmul.mubr.msk.bf16.vlgmr.msra.gmra.mrb[0].mxu0 %vm50_vm1, %v28_v4  ;;  %v2500_v47 = vrot.slane %v152_v28, %v247_v23  ;;  %v2502_v48 = vrot.slane %v152_v28, %v258_v25  ;;  %v2504_v49 = vrot.slane %v152_v28, %v269_v26  ;;  %v2506_v50 = vrot.slane %v152_v28, %v280_v27 }
   0xb   :  { %2091 = vmatprep.mubr.msk.bf16.mxu0 %vm2375_vm0, %v3050_v0 }
  0xdd   :  { %v88_v6 = vpop.f32.mrb[0].mxu0 }
  0xde   :  { %v89_v7 = vadd.f32 %v1880_v5, %v88_v6  ;;  %v2063_v8 = vpop.f32.mrb[1].mxu0 }
  0xdf   :  { %v91_v9 = vpop.f32.mrb[2].mxu0 }
  0xe0   :  { %v95_v10 = vpack.c.bf16 %v89_v7, %v89_v7  ;;  %v2064_v11 = vpop.f32.mrb[3].mxu0  ;;  %v2540_v9 = vld [vmem:[%s3044_s5 + $0x28] ss:$0 sm:$0xff] }
  0xe2   :  { %v107_v12 = vsel %vm105_vm2, %v95_v10, 0 }
  0xe3   :  { %2066 = vmatpush3.bf16.msra.mxu1 %v107_v12 }
  0xe4   :  { %2071 = vmatprep.subr.bf16.mxu1 %v3050_v0 }
  0xe6   :  { %2068 = vmatmul.mubr.msk.bf16.vlgmr.msra.gmra.mrb[0].mxu1 %vm101_vm3, %v94_v13 }
  0xe7   :  { %2075 = vmatprep.mubr.msk.bf16.mxu1 %vm2375_vm0, %v3050_v0  ;;  %2072 = vmatpush3.bf16.msra.mxu1 %v2453_v14 }
  0xe8   :  { %2073 = vmatprep.subr.bf16.mxu1 %v3050_v0 }
  0xeb   :  { %2074 = vmatpush3.bf16.msra.mxu1 %v2459_v15 }
 0x1b9   :  { %v143_v29 = vpop.f32.mrb[0].mxu1 }
 0x1ba   :  { %v144_v32 = vadd.f32 %v1884_v24, %v143_v29  ;;  %v2069_v33 = vpop.f32.mrb[1].mxu1 }
 0x1bb   :  { %v146_v37 = vpop.f32.mrb[2].mxu1 }
 0x1bc   :  { %v149_v42 = vmax.f32 %v144_v32, 0.0  ;;  %v2070_v43 = vpop.f32.mrb[3].mxu1 }
 0x1be   :  { %v205_v51 = vmul.f32 %v2475_v30, %v149_v42  ;;  %v216_v52 = vmul.f32 %v2477_v31, %v149_v42  ;;  %v227_v53 = vmul.f32 %v2479_v34, %v149_v42  ;;  %v238_v54 = vmul.f32 %v2481_v35, %v149_v42 }
 0x1bf   :  { %v249_v55 = vmul.f32 %v2483_v36, %v149_v42  ;;  %v260_v56 = vmul.f32 %v2488_v39, %v149_v42  ;;  %v271_v57 = vmul.f32 %v2490_v40, %v149_v42  ;;  %v282_v58 = vmul.f32 %v2492_v41, %v149_v42 }
 0x1c0   :  { %v210_v59 = vadd.f32 %v2486_v38, %v205_v51  ;;  %v221_v60 = vadd.f32 %v2494_v44, %v216_v52  ;;  %v232_v61 = vadd.f32 %v2496_v45, %v227_v53  ;;  %v243_v62 = vadd.f32 %v2498_v46, %v238_v54 }
 0x1c1   :  { %v254_v63 = vadd.f32 %v2500_v47, %v249_v55  ;;  %v265_v1 = vadd.f32 %v2502_v48, %v260_v56  ;;  %v276_v3 = vadd.f32 %v2504_v49, %v271_v57  ;;  %v287_v4 = vadd.f32 %v2506_v50, %v282_v58  ;;  %v2582_v57 = vld [vmem:[%s3046_s4] sm:$0xff]   ;;  %v2589_v58 = vld [vmem:[%s3046_s4 + $0x8] sm:$0xff]  }
 0x1c2   :  { %v2529_v5 = vmax.f32 %v210_v59, 0.0  ;;  %v2531_v6 = vmax.f32 %v221_v60, 0.0  ;;  %v2533_v7 = vmax.f32 %v243_v62, 0.0  ;;  %v2546_v12 = vmax.f32 %v232_v61, 0.0  ;;  %2088 = vmatpush3.bf16.msra.mxu0 %v2582_v57  ;;  %v2596_v59 = vld [vmem:[%s3044_s5 + $0x30] ss:$0 sm:$0xff] }
 0x1c3   :  { %v2535_v8 = vmax.f32 %v254_v63, 0.0  ;;  %v2542_v10 = vmax.f32 %v276_v3, 0.0  ;;  %v2544_v11 = vmax.f32 %v287_v4, 0.0  ;;  %v293_v16 = vmul.f32 %v2525_v2, %v149_v42  ;;  %2089 = vmatprep.subr.bf16.mxu0 %v3050_v0 }
 0x1c4   :  { %v300_v13 = vadd.f32 %v2531_v6, %v2529_v5  ;;  %v2551_v17 = vmax.f32 %v265_v1, 0.0  ;;  %v309_v24 = vadd.f32 %v2533_v7, %v2529_v5 }
 0x1c5   :  { %v303_v19 = vadd.f32 %v2535_v8, %v2533_v7  ;;  %v298_v21 = vadd.f32 %v2540_v9, %v293_v16  ;;  %v306_v23 = vadd.f32 %v2544_v11, %v2542_v10  ;;  %v312_v42 = vadd.f32 %v2535_v8, %v2531_v6 }
 0x1c6   :  { %v301_v20 = vadd.f32 %v300_v13, %v2546_v12  ;;  %v310_v32 = vadd.f32 %v309_v24, %v2542_v10  ;;  %v315_v43 = vadd.f32 %v2551_v17, %v2546_v12  ;;  %2090 = vmatpush3.bf16.msra.mxu0 %v2589_v58 }
 0x1c7   :  { %v304_v22 = vadd.f32 %v303_v19, %v2551_v17  ;;  %v2562_v27 = vmax.f32 %v298_v21, 0.0  ;;  %v313_v52 = vadd.f32 %v312_v42, %v2544_v11  ;;  %2103 = vmatprep.subr.bf16.mxu0 %v3050_v0 }
 0x1c8   :  { %v302_v25 = vmul.f32 0.33333334, %v301_v20  ;;  %v311_v37 = vmul.f32 0.33333334, %v310_v32 }
 0x1c9   :  { %v305_v26 = vmul.f32 0.33333334, %v304_v22  ;;  %v307_v29 = vadd.f32 %v306_v23, %v2562_v27  ;;  %v316_v53 = vadd.f32 %v315_v43, %v2562_v27  ;;  %v314_v54 = vmul.f32 0.33333334, %v313_v52 }
 0x1cb   :  { %v318_v28 = vpack.c.bf16 %v305_v26, %v302_v25  ;;  %v308_v33 = vmul.f32 0.33333334, %v307_v29  ;;  %v317_v55 = vmul.f32 0.33333334, %v316_v53 }
 0x1cd   :  { %2076 = vmatmul.mubr.msk.bf16.vlgmr.msra.gmra.mrb[4].mxu1 %vm50_vm1, %v318_v28  ;;  %v319_v51 = vpack.c.bf16 %v311_v37, %v308_v33  ;;  %v320_v56 = vpack.c.bf16 %v317_v55, %v314_v54 }
 0x1ce   :  { %2079 = vmatprep.mubr.msk.bf16.mxu1 %vm2375_vm0, %v3050_v0 }
 0x1d5   :  { %2080 = vmatmul.mubr.msk.bf16.gmra.mrb[8].mxu1 %vm50_vm1, %v319_v51 }
 0x1d6   :  { %2083 = vmatprep.mubr.msk.bf16.mxu1 %vm2375_vm0, %v3050_v0 }
 0x1dd   :  { %2084 = vmatmul.mubr.msk.bf16.gmra.mrb[12].mxu1 %vm50_vm1, %v320_v56 }
 0x2a0   :  { %v380_v60 = vpop.f32.mrb[4].mxu1 }
 0x2a1   :  { %v381_v61 = vadd.f32 %v2596_v59, %v380_v60  ;;  %v2077_v62 = vpop.f32.mrb[5].mxu1 }
 0x2a2   :  { %v383_v63 = vpop.f32.mrb[6].mxu1 }
 0x2a3   :  { %v403_v1 = vadd.f32 3.0, %v381_v61  ;;  %v384_v3 = vadd.f32 %v2596_v59, %v383_v63  ;;  %v2078_v4 = vpop.f32.mrb[7].mxu1 }
 0x2a5   :  { %v409_v13 = vmax.f32 %v403_v1, 0.0  ;;  %v404_v16 = vadd.f32 3.0, %v384_v3 }
 0x2a7   :  { %v415_v19 = vmin.f32 %v409_v13, 6.0  ;;  %v410_v20 = vmax.f32 %v404_v16, 0.0 }
 0x2a8   :  { %v388_v21 = vpop.f32.mrb[8].mxu1 }
 0x2a9   :  { %v421_v22 = vmul.f32 %v415_v19, %v381_v61  ;;  %v416_v23 = vmin.f32 %v410_v20, 6.0  ;;  %v389_v24 = vadd.f32 %v2596_v59, %v388_v21  ;;  %v2081_v25 = vpop.f32.mrb[9].mxu1 }
 0x2aa   :  { %v391_v26 = vpop.f32.mrb[10].mxu1 }
 0x2ab   :  { %v422_v28 = vmul.f32 %v416_v23, %v384_v3  ;;  %v405_v29 = vadd.f32 3.0, %v389_v24  ;;  %v392_v32 = vadd.f32 %v2596_v59, %v391_v26  ;;  %v2082_v33 = vpop.f32.mrb[11].mxu1  ;;  %v427_v37 = vmul.f32 0.16666667, %v421_v22 }
 0x2ad   :  { %v428_v42 = vmul.f32 0.16666667, %v422_v28  ;;  %v411_v43 = vmax.f32 %v405_v29, 0.0  ;;  %v406_v51 = vadd.f32 3.0, %v392_v32 }
 0x2af   :  { %v433_v52 = vpack.c.bf16 %v428_v42, %v427_v37  ;;  %v417_v53 = vmin.f32 %v411_v43, 6.0  ;;  %v412_v54 = vmax.f32 %v406_v51, 0.0  ;;  %v2616_v37 = vld [vmem:[%s3042_s3 + $0xa0] sm:$0xff]  }
 0x2b0   :  { %v396_v55 = vpop.f32.mrb[12].mxu1  ;;  %3056 = vst [vmem:[#allocation2_spill] sm:$0xff] %v2616_v37 }
 0x2b1   :  { %v423_v56 = vmul.f32 %v417_v53, %v389_v24  ;;  %v418_v60 = vmin.f32 %v412_v54, 6.0  ;;  %v397_v61 = vadd.f32 %v2596_v59, %v396_v55  ;;  %v2085_v62 = vpop.f32.mrb[13].mxu1  ;;  %2092 = vmatmul.mubr.msk.bf16.vlgmr.msra.gmra.mrb[4].mxu0 %vm50_vm1, %v433_v52 }
 0x2b2   :  { %v399_v63 = vpop.f32.mrb[14].mxu1  ;;  %2095 = vmatprep.mubr.msk.bf16.mxu0 %vm2375_vm0, %v3050_v0  ;;  %2104 = vmatpush3.bf16.msra.mxu0 %v2616_v37 }
 0x2b3   :  { %v424_v1 = vmul.f32 %v418_v60, %v392_v32  ;;  %v407_v3 = vadd.f32 3.0, %v397_v61  ;;  %v400_v4 = vadd.f32 %v2596_v59, %v399_v63  ;;  %v2086_v13 = vpop.f32.mrb[15].mxu1  ;;  %v429_v16 = vmul.f32 0.16666667, %v423_v56  ;;  %2105 = vmatprep.subr.bf16.mxu0 %v3050_v0  ;;  %v2629_v56 = vld [vmem:[%s3047_s6] ss:$0 sm:$0xff] }
 0x2b4   :  { %3057 = vst [vmem:[#allocation3_spill] sm:$0xff] %v2629_v56 }
 0x2b5   :  { %v430_v19 = vmul.f32 0.16666667, %v424_v1  ;;  %v413_v20 = vmax.f32 %v407_v3, 0.0  ;;  %v408_v21 = vadd.f32 3.0, %v400_v4 }
 0x2b7   :  { %v434_v22 = vpack.c.bf16 %v430_v19, %v429_v16  ;;  %v419_v23 = vmin.f32 %v413_v20, 6.0  ;;  %v414_v24 = vmax.f32 %v408_v21, 0.0 }
 0x2b9   :  { %v425_v25 = vmul.f32 %v419_v23, %v397_v61  ;;  %v420_v26 = vmin.f32 %v414_v24, 6.0  ;;  %2096 = vmatmul.mubr.msk.bf16.gmra.mrb[8].mxu0 %vm50_vm1, %v434_v22 }
 0x2ba   :  { %2099 = vmatprep.mubr.msk.bf16.mxu0 %vm2375_vm0, %v3050_v0 }
 0x2bb   :  { %v426_v28 = vmul.f32 %v420_v26, %v400_v4  ;;  %v431_v29 = vmul.f32 0.16666667, %v425_v25 }
 0x2bd   :  { %v432_v32 = vmul.f32 0.16666667, %v426_v28 }
 0x2bf   :  { %v435_v33 = vpack.c.bf16 %v432_v32, %v431_v29 }
 0x2c1   :  { %2100 = vmatmul.mubr.msk.bf16.gmra.mrb[12].mxu0 %vm50_vm1, %v435_v33  ;;  %v2637_v33 = vld [vmem:[%s3042_s3 + $0xa8] sm:$0xff]  }
 0x2c2   :  { %2107 = vmatprep.mubr.msk.bf16.mxu0 %vm2375_vm0, %v3050_v0  ;;  %3058 = vst [vmem:[#allocation4_spill] sm:$0xff] %v2637_v33  ;;  %2106 = vmatpush3.bf16.msra.mxu0 %v2637_v33 }
 0x2c3   :  { %2111 = vmatprep.subr.bf16.mxu0 %v3050_v0 }
 0x384   :  { %v2620_v42 = vpop.f32.mrb[4].mxu0 }
 0x385   :  { %v2093_v43 = vpop.f32.mrb[5].mxu0 }
 0x386   :  { %v2622_v51 = vpop.f32.mrb[6].mxu0  ;;  %v2644_v43 = vld [vmem:[%s3042_s3 + $0x60] sm:$0xff]  }
 0x387   :  { %v2094_v52 = vpop.f32.mrb[7].mxu0  ;;  %1974 = vmatprep.subr.bf16.mxu1 %v2644_v43 }
 0x388   :  { %v2649_v52 = vld [vmem:[%s3042_s3 + $0x20] sm:$0xff]  }
 0x389   :  { %1975 = vmatpush3.bf16.msra.mxu1 %v2649_v52 }
 0x38c   :  { %v2624_v53 = vpop.f32.mrb[8].mxu0 }
 0x38d   :  { %v2097_v54 = vpop.f32.mrb[9].mxu0 }
 0x38e   :  { %v506_v55 = vpop.f32.mrb[10].mxu0  ;;  %v2654_v54 = vld [vmem:[%s3042_s3 + $0x68] sm:$0xff]  }
 0x38f   :  { %v2098_v60 = vpop.f32.mrb[11].mxu0  ;;  %v507_v61 = vadd.f32 %v2629_v56, %v506_v55  ;;  %1976 = vmatprep.subr.bf16.mxu1 %v2654_v54 }
 0x390   :  { %v2662_v60 = vld [vmem:[%s3042_s3 + $0x28] sm:$0xff]  }
 0x391   :  { %v533_v62 = vsub.f32 0.0, %v507_v61  ;;  %1977 = vmatpush3.bf16.msra.mxu1 %v2662_v60 }
 0x393   :  { %v536_v20 = vmul.f32 1.442695, %v533_v62  ;;  %v2668_v62 = vld [vmem:[%s3042_s3 + $0x70] sm:$0xff]  }
 0x394   :  { %v511_v63 = vpop.f32.mrb[12].mxu0  ;;  %1978 = vmatprep.subr.bf16.mxu1 %v2668_v62 }
 0x395   :  { %v512_v1 = vadd.f32 %v2629_v56, %v511_v63  ;;  %v2101_v3 = vpop.f32.mrb[13].mxu0  ;;  %v2675_v63 = vld [vmem:[%s3042_s3 + $0x30] sm:$0xff]  }
 0x396   :  { %v514_v4 = vpop.f32.mrb[14].mxu0  ;;  %v2681_v3 = vld [vmem:[%s3042_s3 + $0x78] sm:$0xff]   ;;  %1979 = vmatpush3.bf16.msra.mxu1 %v2675_v63 }
 0x397   :  { %v534_v13 = vsub.f32 0.0, %v512_v1  ;;  %v515_v16 = vadd.f32 %v2629_v56, %v514_v4  ;;  %v2102_v19 = vpop.f32.mrb[15].mxu0  ;;  %v2688_v4 = vld [vmem:[%s3042_s3 + $0x38] sm:$0xff]   ;;  %1980 = vmatprep.subr.bf16.mxu1 %v2681_v3 }
 0x398   :  { %v2706_v19 = vld [vmem:[%s3042_s3 + $0x88] sm:$0xff]  }
 0x399   :  { %v538_v21 = vmul.f32 1.442695, %v534_v13  ;;  %v535_v22 = vsub.f32 0.0, %v515_v16  ;;  %v2694_v13 = vld [vmem:[%s3042_s3 + $0x80] sm:$0xff]  }
 0x39a   :  { %1981 = vmatpush3.bf16.msra.mxu1 %v2688_v4  ;;  %v2700_v16 = vld [vmem:[%s3042_s3 + $0x40] sm:$0xff]  }
 0x39b   :  { %2286 = vpow2.f32 %v538_v21  ;;  %v540_v23 = vmul.f32 1.442695, %v535_v22  ;;  %1982 = vmatprep.subr.bf16.mxu1 %v2694_v13  ;;  %v499_v21 = vadd.f32 %v2629_v56, %v2622_v51  ;;  %v504_v22 = vadd.f32 %v2629_v56, %v2624_v53  ;;  %v2719_v53 = vld [vmem:[%s3042_s3 + $0x48] sm:$0xff]  }
 0x39c   :  { %2288 = vpow2.f32 %v536_v20  ;;  %v496_v20 = vadd.f32 %v2629_v56, %v2620_v42 }
 0x39d   :  { %2290 = vpow2.f32 %v540_v23 }
 0x39e   :  { %1983 = vmatpush3.bf16.msra.mxu1 %v2700_v16  ;;  %v518_v23 = vsub.f32 0.0, %v496_v20  ;;  %v2724_v20 = vld [vmem:[%s3042_s3 + $0x90] sm:$0xff]  }
 0x39f   :  { %1984 = vmatprep.subr.bf16.mxu1 %v2706_v19 }
 0x3a2   :  { %1985 = vmatpush3.bf16.msra.mxu1 %v2719_v53 }
 0x3a3   :  { %1986 = vmatprep.subr.bf16.mxu1 %v2724_v20 }
 0x3a5   :  { %v2287_v24 = vpop.eup %2286 }
 0x3a6   :  { %v2289_v25 = vpop.eup %2288  ;;  %v543_v26 = vadd.f32 1.0, %v2287_v24  ;;  %v519_v24 = vsub.f32 0.0, %v499_v21 }
 0x3a7   :  { %v2291_v28 = vpop.eup %2290  ;;  %v542_v32 = vadd.f32 1.0, %v2289_v25  ;;  %v520_v25 = vsub.f32 0.0, %v504_v22 }
 0x3a8   :  { %2292 = vrcp.f32 %v543_v26  ;;  %v544_v29 = vadd.f32 1.0, %v2291_v28  ;;  %v521_v26 = vmul.f32 1.442695, %v518_v23  ;;  %v523_v28 = vmul.f32 1.442695, %v519_v24 }
 0x3aa   :  { %2294 = vrcp.f32 %v544_v29  ;;  %v525_v29 = vmul.f32 1.442695, %v520_v25 }
 0x3ab   :  { %2296 = vrcp.f32 %v542_v32 }
 0x3ac   :  { %2298 = vpow2.f32 %v521_v26  ;;  %v2734_v26 = vld [vmem:[%s3042_s3 + $0x50] sm:$0xff]  }
 0x3ad   :  { %2300 = vpow2.f32 %v523_v28  ;;  %1987 = vmatpush3.bf16.msra.mxu1 %v2734_v26 }
 0x3ae   :  { %2302 = vpow2.f32 %v525_v29  ;;  %v2739_v29 = vld [vmem:[%s3042_s3 + $0x98] sm:$0xff]  }
 0x3af   :  { %1988 = vmatprep.subr.bf16.mxu1 %v2739_v29 }
 0x3b2   :  { %v2293_v55 = vpop.eup %2292 }
 0x3b3   :  { %556 = vrot.lane.b32.xlu1 %v2293_v55, %s2376_s16 }
 0x3b4   :  { %v2295_v61 = vpop.eup %2294 }
 0x3b5   :  { %562 = vrot.lane.b32.xlu0 %v2295_v61, %s2376_s16  ;;  %v2297_v1 = vpop.eup %2296 }
 0x3b6   :  { %v2299_v32 = vpop.eup %2298 }
 0x3b7   :  { %v2301_v55 = vpop.eup %2300 }
 0x3b8   :  { %v2303_v61 = vpop.eup %2302  ;;  %v528_v42 = vadd.f32 1.0, %v2301_v55 }
 0x3b9   :  { %550 = vrot.lane.b32.xlu0 %v2297_v1, %s2376_s16  ;;  %v527_v1 = vadd.f32 1.0, %v2299_v32  ;;  %v529_v0 = vadd.f32 1.0, %v2303_v61 }
 0x3bb   :  { %2304 = vrcp.f32 %v527_v1 }
 0x3bc   :  { %2306 = vrcp.f32 %v528_v42 }
 0x3bd   :  { %2308 = vrcp.f32 %v529_v0 }
 0x3c5   :  { %v2305_v51 = vpop.eup %2304 }
 0x3c6   :  { %v2307_v21 = vpop.eup %2306  ;;  %v554_v0 = vmul.f32 %v2305_v51, %v2531_v6 }
 0x3c7   :  { %v2309_v22 = vpop.eup %2308  ;;  %v570_v24 = vmul.f32 %v2307_v21, %v2551_v17  ;;  %v560_v17 = vmul.f32 %v2305_v51, %v2546_v12  ;;  %v566_v42 = vmul.f32 %v2307_v21, %v2533_v7  ;;  %v3059_v12 = vmov 0.0  }
 0x3c8   :  { %v576_v25 = vmul.f32 %v2309_v22, %v2562_v27  ;;  %v574_v6 = vmul.f32 %v2309_v22, %v2544_v11  ;;  %v2748_v27 = vld [vmem:[%s3042_s3 + $0x58] sm:$0xff]  }
 0x3c9   :  { %1989 = vmatpush3.bf16.msra.mxu1 %v2748_v27 }
 0x3ca   :  { %2119 = vmatprep.subr.bf16.mxu1 %v3059_v12 }
 0x425   :  { %v557_v23 = vpop.permute.xlu1 %556 }
 0x426   :  { %v559_v32 = vmul.f32 %v557_v23, %v554_v0  ;;  %v572_v0 = vmul.f32 %v2309_v22, %v2542_v10  ;;  %v568_v22 = vmul.f32 %v2307_v21, %v2535_v8 }
 0x427   :  { %v563_v28 = vpop.permute.xlu0 %562 }
 0x428   :  { %v571_v55 = vmul.f32 %v570_v24, %v563_v28  ;;  %v577_v61 = vmul.f32 %v576_v25, %v563_v28  ;;  %v575_v25 = vmul.f32 %v574_v6, %v557_v23  ;;  %v565_v33 = vmul.f32 %v563_v28, %v560_v17 }
 0x429   :  { %v548_v28 = vmul.f32 %v2305_v51, %v2529_v5  ;;  %v569_v6 = vmul.f32 %v568_v22, %v557_v23 }
 0x42a   :  { %v612_v1 = vpack.c.bf16 %v577_v61, %v577_v61  ;;  %v2218_v24 = vpack.i.bf16 %v559_v32, %v571_v55 }
 0x42b   :  { %v551_v56 = vpop.permute.xlu0 %550 }
 0x42c   :  { %v567_v37 = vmul.f32 %v566_v42, %v551_v56  ;;  %v573_v11 = vmul.f32 %v572_v0, %v551_v56  ;;  %2108 = vmatmul.mubr.msk.bf16.vlgmr.msra.gmra.mrb[16].mxu0 %vm50_vm1, %v612_v1  ;;  %2219 = vrot.lane.b32.xlu1 %v2218_v24, %s2377_s19  ;;  %v553_v17 = vmul.f32 %v551_v56, %v548_v28  ;;  %v2272_v28 = vld [vmem:[%s3042_s3 + $0xb0] sm:$0xff]  }
 0x42d   :  { %2115 = vmatprep.mubr.msk.bf16.mxu0 %vm2375_vm0, %v3059_v12  ;;  %2112 = vmatpush3.bf16.msra.mxu0 %v2272_v28 }
 0x42e   :  { %v2223_v61 = vpack.i.bf16 %v565_v33, %v573_v11  ;;  %v2228_v7 = vpack.i.bf16 %v567_v37, %v575_v25  ;;  %2113 = vmatprep.subr.bf16.mxu0 %v3059_v12 }
 0x430   :  { %2224 = vrot.lane.b32.xlu0 %v2223_v61, %s2378_s20  ;;  %2229 = vrot.lane.b32.xlu1 %v2228_v7, %s2376_s16 }
 0x49e   :  { %v2220_v10 = vpop.permute.xlu1 %2219 }
 0x49f   :  { %v2222_v32 = vunpack.i.h.bf16 %v2220_v10  ;;  %v2221_v55 = vunpack.i.l.bf16 %v2220_v10 }
 0x4a1   :  { %v602_v25 = vsel %vm50_vm1, %v553_v17, %v2222_v32  ;;  %v607_v11 = vsel %vm50_vm1, %v569_v6, %v2221_v55  ;;  %v2273_v32 = vld [vmem:[%s3042_s3 + $0xb8] sm:$0xff]  }
 0x4a2   :  { %v2225_v1 = vpop.permute.xlu0 %2224  ;;  %v2230_v37 = vpop.permute.xlu1 %2229  ;;  %2114 = vmatpush3.bf16.msra.mxu0 %v2273_v32  ;;  %v2781_v6 = vld [vmem:[%s3044_s5 + $0x38] ss:$0 sm:$0xff] }
 0x4a3   :  { %v2227_v33 = vunpack.i.h.bf16 %v2225_v1  ;;  %v2226_v42 = vunpack.i.l.bf16 %v2225_v1  ;;  %v2232_v0 = vunpack.i.h.bf16 %v2230_v37  ;;  %v2231_v24 = vunpack.i.l.bf16 %v2230_v37  ;;  %2125 = vmatprep.subr.bf16.mxu0 %v3059_v12 }
 0x4a5   :  { %v604_v8 = vsel %vm603_vm4, %v602_v25, %v2227_v33  ;;  %v608_v5 = vsel %vm603_vm4, %v607_v11, %v2226_v42  ;;  %v1924_v11 = vld [vmem:[%s3044_s5 + $0x48] ss:$0 sm:$0xff] }
 0x4a6   :  { %v606_v51 = vsel %vm605_vm5, %v604_v8, %v2232_v0  ;;  %v609_v56 = vsel %vm605_vm5, %v608_v5, %v2231_v24  ;;  %v1923_v8 = vld [vmem:[%s3044_s5 + $0x40] ss:$0 sm:$0xff] }
 0x4a7   :  { %v610_v21 = vpack.c.bf16 %v606_v51, %v606_v51  ;;  %v611_v23 = vpack.c.bf16 %v609_v56, %v609_v56 }
 0x4a9   :  { %760 = vmatprep.mubr.bf16.mxu1 %v611_v23 }
 0x4aa   :  { %761 = vmatmul.mubr.bf16.vlgmr.msra.gmra.mrb[16].mxu1 %v610_v21 }
 0x4ab   :  { %2121 = vmatprep.mubr.msk.bf16.mxu1 %vm2375_vm0, %v3059_v12 }
 0x4ff   :  { %v802_v61 = vpop.f32.mrb[16].mxu0 }
 0x500   :  { %v2109_v7 = vpop.f32.mrb[17].mxu0 }
 0x501   :  { %v805_v10 = vpop.f32.mrb[18].mxu0 }
 0x502   :  { %v2110_v22 = vpop.f32.mrb[19].mxu0 }
 0x57d   :  { %v1990_v55 = vpop.f32.mrb[16].mxu1 }
 0x57e   :  { %v1991_v17 = vpop.f32.mrb[17].mxu1 }
 0x57f   :  { %v1992_v1 = vadd.f32 %v1991_v17, %v1990_v55  ;;  %v1993_v37 = vpop.f32.mrb[18].mxu1  ;;  %v927_v55 = vld [vmem:[%s3048_s1] sm:$0xff] }
 0x580   :  { %v1994_v33 = vpop.f32.mrb[19].mxu1  ;;  %vm928_vm7 = vcmp.gt.f32.partialorder %v927_v55, 0.0 }
 0x581   :  { %v763_v42 = vadd.f32 %v1992_v1, %v2781_v6 }
 0x583   :  { %v803_v0 = vadd.f32 %v802_v61, %v763_v42 }
 0x585   :  { %v808_v24 = vmax.f32 %v803_v0, 0.0 }
 0x587   :  { %v809_v25 = vpack.c.bf16 %v808_v24, %v808_v24 }
 0x589   :  { %2116 = vmatmul.mubr.msk.bf16.vlgmr.msra.gmra.mrb[20].mxu0 %vm50_vm1, %v809_v25 }
 0x58a   :  { %2126 = vmatpush3.bf16.msra.mxu0 %v2453_v14  ;;  %2129 = vmatprep.mubr.msk.bf16.mxu0 %vm2375_vm0, %v3059_v12 }
 0x58b   :  { %2127 = vmatprep.subr.bf16.mxu0 %v3059_v12 }
 0x58e   :  { %2128 = vmatpush3.bf16.msra.mxu0 %v2459_v15 }
 0x58f   :  { %2014 = vmatprep.subr.bf16.mxu0 %v2644_v43 }
 0x65c   :  { %v863_v5 = vpop.f32.mrb[20].mxu0 }
 0x65d   :  { %v943_v51 = vpack.c.bf16 %v863_v5, %v863_v5  ;;  %v2117_v14 = vpop.f32.mrb[21].mxu0  ;;  %v883_v56 = vmul.f32 %v1924_v11, %v863_v5  ;;  %v874_v21 = vmul.f32 %v1923_v8, %v863_v5 }
 0x65e   :  { %v866_v23 = vpop.f32.mrb[22].mxu0 }
 0x65f   :  { %v2118_v61 = vpop.f32.mrb[23].mxu0  ;;  %v948_v7 = vsel %vm105_vm2, %v943_v51, 0  ;;  %v884_v15 = vsel %vm50_vm1, %v883_v56, 0.0  ;;  %v875_v43 = vsel %vm50_vm1, %v874_v21, 0.0  ;;  %v1926_v21 = vld [vmem:[%s3044_s5 + $0x50] ss:$0 sm:$0xff] }
 0x660   :  { %2120 = vmatpush3.bf16.msra.mxu1 %v948_v7  ;;  %885 = vadd.xlane.f32.xlu0 %v884_v15  ;;  %v1927_v61 = vld [vmem:[%s3044_s5 + $0x58] ss:$0 sm:$0xff] }
 0x661   :  { %876 = vadd.xlane.f32.xlu1 %v875_v43  ;;  %2141 = vmatprep.subr.bf16.mxu1 %v3059_v12 }
 0x6ed   :  { %v886_v10 = vpop.xlane.xlu0 %885 }
 0x6ee   :  { %887 = vxpose.xlu0.b32.start.end [1/1] (short) (narrow) %v886_v10, 8  ;;  %v877_v32 = vpop.xlane.xlu1 %876 }
 0x76e   :  { %v903_v22 = vpop.trf.xlu0 }
 0x76f   :  { %v922_v28 = vrot.slane %v903_v22, %v2463_v18 }
 0x771   :  { %v923_v17 = vadd.f32 %v922_v28, %v877_v32 }
 0x773   :  { %vm924_vm6 = vcmp.ge.f32.partialorder %v923_v17, 0.0  ;;  %v925_v1 = vmul.f32 0.2, %v923_v17 }
 0x775   :  { %v926_v37 = vsel %vm924_vm6, %v923_v17, %v925_v1 }
 0x776   :  { %v929_v33 = vsel %vm928_vm7, %v926_v37, -1e+30 }
 0x777   :  { %v930_v42 = vsel %vm101_vm3, %v929_v33, -inf }
 0x778   :  { %931 = vmax.xlane.f32.xlu1 %v930_v42 }
 0x805   :  { %v932_v0 = vpop.xlane.xlu1 %931 }
 0x806   :  { %v933_v24 = vsub.f32 %v929_v33, %v932_v0 }
 0x808   :  { %v934_v25 = vmul.f32 1.442695, %v933_v24 }
 0x80a   :  { %2310 = vpow2.f32 %v934_v25 }
 0x814   :  { %v2311_v11 = vpop.eup %2310 }
 0x815   :  { %v936_v18 = vmul.f32 %v2311_v11, %v927_v55 }
 0x817   :  { %v937_v8 = vsel %vm101_vm3, %v936_v18, 0.0 }
 0x818   :  { %938 = vadd.xlane.f32.xlu1 %v937_v8 }
 0x8a5   :  { %v939_v5 = vpop.xlane.xlu1 %938 }
 0x8a6   :  { %2312 = vrcp.f32 %v939_v5 }
 0x8b0   :  { %v2313_v51 = vpop.eup %2312 }
 0x8b1   :  { %v941_v14 = vmul.f32 %v2313_v51, %v936_v18 }
 0x8b3   :  { %v942_v56 = vpack.c.bf16 %v941_v14, %v941_v14 }
 0x8b5   :  { %2122 = vmatmul.mubr.msk.bf16.vlgmr.msra.gmra.mrb[20].mxu1 %vm101_vm3, %v942_v56 }
 0x8b6   :  { %2142 = vmatpush3.bf16.msra.mxu1 %v2582_v57  ;;  %2145 = vmatprep.mubr.msk.bf16.mxu1 %vm2375_vm0, %v3059_v12 }
 0x8b7   :  { %2143 = vmatprep.subr.bf16.mxu1 %v3059_v12 }
 0x8ba   :  { %2144 = vmatpush3.bf16.msra.mxu1 %v2589_v58 }
 0x8bb   :  { %2157 = vmatprep.subr.bf16.mxu1 %v3059_v12 }
 0x988   :  { %v984_v23 = vpop.f32.mrb[20].mxu1 }
 0x989   :  { %v995_v7 = vmul.f32 %v1926_v21, %v984_v23  ;;  %v2123_v57 = vpop.f32.mrb[21].mxu1 }
 0x98a   :  { %v987_v15 = vpop.f32.mrb[22].mxu1 }
 0x98b   :  { %v1001_v43 = vadd.f32 %v1927_v61, %v995_v7  ;;  %v2124_v10 = vpop.f32.mrb[23].mxu1 }
 0x98d   :  { %v1002_v22 = vmax.f32 %v1001_v43, 0.0 }
 0x98f   :  { %v1003_v28 = vmul.f32 %v1002_v22, %v2475_v30  ;;  %v1006_v58 = vmul.f32 %v1002_v22, %v2477_v31  ;;  %v1009_v32 = vmul.f32 %v1002_v22, %v2479_v34  ;;  %v1012_v55 = vmul.f32 %v1002_v22, %v2481_v35 }
 0x990   :  { %v1015_v17 = vmul.f32 %v1002_v22, %v2483_v36  ;;  %v1018_v1 = vmul.f32 %v1002_v22, %v2488_v39  ;;  %v1021_v37 = vmul.f32 %v1002_v22, %v2490_v40  ;;  %v1024_v33 = vmul.f32 %v1002_v22, %v2492_v41 }
 0x991   :  { %v1004_v42 = vadd.f32 %v1003_v28, %v2486_v38  ;;  %v1007_v0 = vadd.f32 %v1006_v58, %v2494_v44  ;;  %v1010_v30 = vadd.f32 %v1009_v32, %v2496_v45  ;;  %v1013_v31 = vadd.f32 %v1012_v55, %v2498_v46 }
 0x992   :  { %v1016_v34 = vadd.f32 %v1015_v17, %v2500_v47  ;;  %v1019_v35 = vadd.f32 %v1018_v1, %v2502_v48  ;;  %v1022_v36 = vadd.f32 %v1021_v37, %v2504_v49  ;;  %v1025_v39 = vadd.f32 %v1024_v33, %v2506_v50 }
 0x993   :  { %v2836_v24 = vmax.f32 %v1004_v42, 0.0  ;;  %v2838_v40 = vmax.f32 %v1007_v0, 0.0  ;;  %v2840_v41 = vmax.f32 %v1013_v31, 0.0  ;;  %v2848_v46 = vmax.f32 %v1010_v30, 0.0 }
 0x994   :  { %v2842_v38 = vmax.f32 %v1016_v34, 0.0  ;;  %v2844_v44 = vmax.f32 %v1022_v36, 0.0  ;;  %v2846_v45 = vmax.f32 %v1025_v39, 0.0  ;;  %v1027_v48 = vmul.f32 %v2525_v2, %v1002_v22 }
 0x995   :  { %v1030_v47 = vadd.f32 %v2838_v40, %v2836_v24  ;;  %v2853_v49 = vmax.f32 %v1019_v35, 0.0  ;;  %v1039_v5 = vadd.f32 %v2840_v41, %v2836_v24 }
 0x996   :  { %v1033_v50 = vadd.f32 %v2842_v38, %v2840_v41  ;;  %v1028_v11 = vadd.f32 %v2540_v9, %v1027_v48  ;;  %v1036_v8 = vadd.f32 %v2846_v45, %v2844_v44  ;;  %v1042_v7 = vadd.f32 %v2842_v38, %v2838_v40 }
 0x997   :  { %v1031_v25 = vadd.f32 %v1030_v47, %v2848_v46  ;;  %v1040_v23 = vadd.f32 %v1039_v5, %v2844_v44  ;;  %v1045_v57 = vadd.f32 %v2853_v49, %v2848_v46 }
 0x998   :  { %v1034_v18 = vadd.f32 %v1033_v50, %v2853_v49  ;;  %v2864_v2 = vmax.f32 %v1028_v11, 0.0  ;;  %v1043_v43 = vadd.f32 %v1042_v7, %v2846_v45 }
 0x999   :  { %v1032_v51 = vmul.f32 0.33333334, %v1031_v25  ;;  %v1041_v61 = vmul.f32 0.33333334, %v1040_v23 }
 0x99a   :  { %v1035_v14 = vmul.f32 0.33333334, %v1034_v18  ;;  %v1037_v21 = vadd.f32 %v1036_v8, %v2864_v2  ;;  %v1046_v10 = vadd.f32 %v1045_v57, %v2864_v2  ;;  %v3060_v18 = vld [vmem:[#allocation2_spill] sm:$0xff] }
 0x99c   :  { %v1048_v56 = vpack.c.bf16 %v1035_v14, %v1032_v51  ;;  %v1038_v9 = vmul.f32 0.33333334, %v1037_v21  ;;  %v1047_v22 = vmul.f32 0.33333334, %v1046_v10 }
 0x99e   :  { %2130 = vmatmul.mubr.msk.bf16.vlgmr.msra.gmra.mrb[24].mxu0 %vm50_vm1, %v1048_v56  ;;  %v1049_v15 = vpack.c.bf16 %v1041_v61, %v1038_v9  ;;  %v3061_v61 = vld [vmem:[#allocation4_spill] sm:$0xff] }
 0x99f   :  { %2133 = vmatprep.mubr.msk.bf16.mxu0 %vm2375_vm0, %v3059_v12  ;;  %2015 = vmatpush3.bf16.msra.mxu0 %v2649_v52  ;;  %v1044_v52 = vmul.f32 0.33333334, %v1043_v43 }
 0x9a0   :  { %2016 = vmatprep.subr.bf16.mxu0 %v2654_v54 }
 0x9a1   :  { %v1050_v54 = vpack.c.bf16 %v1047_v22, %v1044_v52 }
 0x9a3   :  { %2017 = vmatpush3.bf16.msra.mxu0 %v2662_v60 }
 0x9a4   :  { %2018 = vmatprep.subr.bf16.mxu0 %v2668_v62 }
 0x9a6   :  { %2134 = vmatmul.mubr.msk.bf16.gmra.mrb[28].mxu0 %vm50_vm1, %v1049_v15 }
 0x9a7   :  { %2137 = vmatprep.mubr.msk.bf16.mxu0 %vm2375_vm0, %v3059_v12  ;;  %2019 = vmatpush3.bf16.msra.mxu0 %v2675_v63 }
 0x9a8   :  { %2020 = vmatprep.subr.bf16.mxu0 %v2681_v3 }
 0x9ab   :  { %2021 = vmatpush3.bf16.msra.mxu0 %v2688_v4 }
 0x9ac   :  { %2022 = vmatprep.subr.bf16.mxu0 %v2694_v13 }
 0x9ae   :  { %2138 = vmatmul.mubr.msk.bf16.gmra.mrb[32].mxu0 %vm50_vm1, %v1050_v54 }
 0x9af   :  { %2023 = vmatpush3.bf16.msra.mxu0 %v2700_v16 }
 0x9b0   :  { %2024 = vmatprep.subr.bf16.mxu0 %v2706_v19 }
 0x9b3   :  { %2025 = vmatpush3.bf16.msra.mxu0 %v2719_v53 }
 0x9b4   :  { %2026 = vmatprep.subr.bf16.mxu0 %v2724_v20 }
 0x9b7   :  { %2027 = vmatpush3.bf16.msra.mxu0 %v2734_v26 }
 0x9b8   :  { %2028 = vmatprep.subr.bf16.mxu0 %v2739_v29 }
 0x9bb   :  { %2029 = vmatpush3.bf16.msra.mxu0 %v2748_v27 }
 0x9bc   :  { %2173 = vmatprep.subr.bf16.mxu0 %v3059_v12 }
 0xa71   :  { %v1094_v60 = vpop.f32.mrb[24].mxu0 }
 0xa72   :  { %v1095_v62 = vadd.f32 %v2596_v59, %v1094_v60  ;;  %v2131_v63 = vpop.f32.mrb[25].mxu0 }
 0xa73   :  { %v1097_v3 = vpop.f32.mrb[26].mxu0 }
 0xa74   :  { %v1117_v4 = vadd.f32 3.0, %v1095_v62  ;;  %v1098_v13 = vadd.f32 %v2596_v59, %v1097_v3  ;;  %v2132_v16 = vpop.f32.mrb[27].mxu0 }
 0xa76   :  { %v1123_v19 = vmax.f32 %v1117_v4, 0.0  ;;  %v1118_v53 = vadd.f32 3.0, %v1098_v13 }
 0xa78   :  { %v1129_v20 = vmin.f32 %v1123_v19, 6.0  ;;  %v1124_v28 = vmax.f32 %v1118_v53, 0.0  ;;  %v3062_v19 = vld [vmem:[#allocation3_spill] sm:$0xff] }
 0xa79   :  { %v1102_v26 = vpop.f32.mrb[28].mxu0 }
 0xa7a   :  { %v1135_v58 = vmul.f32 %v1129_v20, %v1095_v62  ;;  %v1130_v29 = vmin.f32 %v1124_v28, 6.0  ;;  %v1103_v27 = vadd.f32 %v2596_v59, %v1102_v26  ;;  %v2135_v32 = vpop.f32.mrb[29].mxu0 }
 0xa7b   :  { %v1105_v55 = vpop.f32.mrb[30].mxu0 }
 0xa7c   :  { %v1136_v17 = vmul.f32 %v1130_v29, %v1098_v13  ;;  %v1119_v1 = vadd.f32 3.0, %v1103_v27  ;;  %v1106_v37 = vadd.f32 %v2596_v59, %v1105_v55  ;;  %v2136_v33 = vpop.f32.mrb[31].mxu0  ;;  %v1141_v42 = vmul.f32 0.16666667, %v1135_v58 }
 0xa7e   :  { %v1142_v0 = vmul.f32 0.16666667, %v1136_v17  ;;  %v1125_v30 = vmax.f32 %v1119_v1, 0.0  ;;  %v1120_v31 = vadd.f32 3.0, %v1106_v37 }
 0xa80   :  { %v1147_v34 = vpack.c.bf16 %v1142_v0, %v1141_v42  ;;  %v1131_v35 = vmin.f32 %v1125_v30, 6.0  ;;  %v1126_v36 = vmax.f32 %v1120_v31, 0.0 }
 0xa81   :  { %v1110_v39 = vpop.f32.mrb[32].mxu0 }
 0xa82   :  { %v1137_v47 = vmul.f32 %v1131_v35, %v1103_v27  ;;  %v1132_v48 = vmin.f32 %v1126_v36, 6.0  ;;  %v1111_v50 = vadd.f32 %v2596_v59, %v1110_v39  ;;  %v2139_v25 = vpop.f32.mrb[33].mxu0  ;;  %2146 = vmatmul.mubr.msk.bf16.vlgmr.msra.gmra.mrb[24].mxu1 %vm50_vm1, %v1147_v34 }
 0xa83   :  { %v1113_v11 = vpop.f32.mrb[34].mxu0  ;;  %2149 = vmatprep.mubr.msk.bf16.mxu1 %vm2375_vm0, %v3059_v12  ;;  %2158 = vmatpush3.bf16.msra.mxu1 %v3060_v18 }
 0xa84   :  { %v1138_v8 = vmul.f32 %v1132_v48, %v1106_v37  ;;  %v1121_v5 = vadd.f32 3.0, %v1111_v50  ;;  %v1114_v51 = vadd.f32 %v2596_v59, %v1113_v11  ;;  %v2140_v14 = vpop.f32.mrb[35].mxu0  ;;  %2159 = vmatprep.subr.bf16.mxu1 %v3059_v12  ;;  %v1143_v56 = vmul.f32 0.16666667, %v1137_v47 }
 0xa86   :  { %v1144_v21 = vmul.f32 0.16666667, %v1138_v8  ;;  %v1127_v23 = vmax.f32 %v1121_v5, 0.0  ;;  %v1122_v9 = vadd.f32 3.0, %v1114_v51 }
 0xa87   :  { %2160 = vmatpush3.bf16.msra.mxu1 %v3061_v61 }
 0xa88   :  { %v1148_v7 = vpack.c.bf16 %v1144_v21, %v1143_v56  ;;  %v1133_v57 = vmin.f32 %v1127_v23, 6.0  ;;  %v1128_v15 = vmax.f32 %v1122_v9, 0.0  ;;  %2165 = vmatprep.subr.bf16.mxu1 %v3059_v12 }
 0xa8a   :  { %v1139_v43 = vmul.f32 %v1133_v57, %v1111_v50  ;;  %v1134_v10 = vmin.f32 %v1128_v15, 6.0  ;;  %2150 = vmatmul.mubr.msk.bf16.gmra.mrb[28].mxu1 %vm50_vm1, %v1148_v7 }
 0xa8b   :  { %2153 = vmatprep.mubr.msk.bf16.mxu1 %vm2375_vm0, %v3059_v12 }
 0xa8c   :  { %v1140_v59 = vmul.f32 %v1134_v10, %v1114_v51  ;;  %v1145_v52 = vmul.f32 0.16666667, %v1139_v43 }
 0xa8e   :  { %v1146_v22 = vmul.f32 0.16666667, %v1140_v59 }
 0xa90   :  { %v1149_v54 = vpack.c.bf16 %v1146_v22, %v1145_v52 }
 0xa92   :  { %2154 = vmatmul.mubr.msk.bf16.gmra.mrb[32].mxu1 %vm50_vm1, %v1149_v54 }
 0xa93   :  { %2161 = vmatprep.mubr.msk.bf16.mxu1 %vm2375_vm0, %v3059_v12 }
 0xb55   :  { %v1193_v60 = vpop.f32.mrb[24].mxu1 }
 0xb56   :  { %v2147_v62 = vpop.f32.mrb[25].mxu1  ;;  %v1194_v50 = vadd.f32 %v3062_v19, %v1193_v60 }
 0xb57   :  { %v1196_v63 = vpop.f32.mrb[26].mxu1 }
 0xb58   :  { %v2148_v3 = vpop.f32.mrb[27].mxu1  ;;  %v1216_v25 = vsub.f32 0.0, %v1194_v50  ;;  %v1197_v8 = vadd.f32 %v3062_v19, %v1196_v63 }
 0xb5a   :  { %v1219_v11 = vmul.f32 1.442695, %v1216_v25  ;;  %v1217_v51 = vsub.f32 0.0, %v1197_v8 }
 0xb5c   :  { %v1221_v56 = vmul.f32 1.442695, %v1217_v51 }
 0xb5d   :  { %v1201_v4 = vpop.f32.mrb[28].mxu1 }
 0xb5e   :  { %v2151_v13 = vpop.f32.mrb[29].mxu1  ;;  %v1202_v18 = vadd.f32 %v3062_v19, %v1201_v4 }
 0xb5f   :  { %v1204_v16 = vpop.f32.mrb[30].mxu1 }
 0xb60   :  { %v1205_v53 = vadd.f32 %v3062_v19, %v1204_v16  ;;  %v2152_v20 = vpop.f32.mrb[31].mxu1  ;;  %v1218_v5 = vsub.f32 0.0, %v1202_v18  ;;  %v2275_v18 = vld [vmem:[%s3046_s4 + $0x18] sm:$0xff]  }
 0xb62   :  { %v1231_v28 = vsub.f32 0.0, %v1205_v53  ;;  %v1223_v14 = vmul.f32 1.442695, %v1218_v5 }
 0xb64   :  { %v1234_v26 = vmul.f32 1.442695, %v1231_v28 }
 0xb65   :  { %v1209_v58 = vpop.f32.mrb[32].mxu1 }
 0xb66   :  { %2314 = vpow2.f32 %v1234_v26  ;;  %v1210_v29 = vadd.f32 %v3062_v19, %v1209_v58  ;;  %v2155_v27 = vpop.f32.mrb[33].mxu1 }
 0xb67   :  { %v1212_v32 = vpop.f32.mrb[34].mxu1 }
 0xb68   :  { %v1232_v55 = vsub.f32 0.0, %v1210_v29  ;;  %v1213_v17 = vadd.f32 %v3062_v19, %v1212_v32  ;;  %v2156_v1 = vpop.f32.mrb[35].mxu1 }
 0xb6a   :  { %v1236_v37 = vmul.f32 1.442695, %v1232_v55  ;;  %v1233_v33 = vsub.f32 0.0, %v1213_v17 }
 0xb6c   :  { %v1238_v42 = vmul.f32 1.442695, %v1233_v33  ;;  %2316 = vpow2.f32 %v1236_v37 }
 0xb6e   :  { %2318 = vpow2.f32 %v1238_v42 }
 0xb70   :  { %v2315_v0 = vpop.eup %2314 }
 0xb71   :  { %v1240_v30 = vadd.f32 1.0, %v2315_v0 }
 0xb73   :  { %2320 = vrcp.f32 %v1240_v30 }
 0xb76   :  { %v2317_v31 = vpop.eup %2316 }
 0xb77   :  { %v1241_v36 = vadd.f32 1.0, %v2317_v31 }
 0xb78   :  { %v2319_v34 = vpop.eup %2318 }
 0xb79   :  { %v1242_v35 = vadd.f32 1.0, %v2319_v34 }
 0xb7b   :  { %2322 = vrcp.f32 %v1242_v35 }
 0xb7c   :  { %2324 = vrcp.f32 %v1241_v36 }
 0xb7d   :  { %v2321_v39 = vpop.eup %2320  ;;  %2326 = vpow2.f32 %v1219_v11  ;;  %v2274_v11 = vld [vmem:[%s3046_s4 + $0x10] sm:$0xff]  }
 0xb7e   :  { %1248 = vrot.lane.b32.xlu1 %v2321_v39, %s2376_s16  ;;  %2328 = vpow2.f32 %v1223_v14 }
 0xb7f   :  { %2330 = vpow2.f32 %v1221_v56 }
 0xb85   :  { %v2323_v47 = vpop.eup %2322 }
 0xb86   :  { %1260 = vrot.lane.b32.xlu1 %v2323_v47, %s2376_s16  ;;  %v2325_v48 = vpop.eup %2324 }
 0xb87   :  { %v2327_v21 = vpop.eup %2326 }
 0xb88   :  { %v1225_v23 = vadd.f32 1.0, %v2327_v21  ;;  %v2329_v9 = vpop.eup %2328 }
 0xb89   :  { %v2331_v61 = vpop.eup %2330  ;;  %v1227_v7 = vadd.f32 1.0, %v2329_v9 }
 0xb8a   :  { %1254 = vrot.lane.b32.xlu1 %v2325_v48, %s2376_s16  ;;  %2332 = vrcp.f32 %v1225_v23  ;;  %v1226_v57 = vadd.f32 1.0, %v2331_v61 }
 0xb8b   :  { %2334 = vrcp.f32 %v1227_v7  ;;  %v1935_v7 = vld [vmem:[%s3047_s6 + $0x8] ss:$0 sm:$0xff] }
 0xb8c   :  { %2336 = vrcp.f32 %v1226_v57 }
 0xb94   :  { %v2333_v15 = vpop.eup %2332 }
 0xb95   :  { %v1246_v43 = vmul.f32 %v2333_v15, %v2836_v24  ;;  %v2335_v52 = vpop.eup %2334  ;;  %v1258_v60 = vmul.f32 %v2333_v15, %v2848_v46  ;;  %v1252_v19 = vmul.f32 %v2333_v15, %v2838_v40 }
 0xb96   :  { %v2337_v22 = vpop.eup %2336  ;;  %v1270_v54 = vmul.f32 %v2335_v52, %v2844_v44  ;;  %v1274_v62 = vmul.f32 %v2335_v52, %v2864_v2  ;;  %v1272_v20 = vmul.f32 %v2335_v52, %v2846_v45 }
 0xb97   :  { %v1264_v16 = vmul.f32 %v2337_v22, %v2840_v41  ;;  %v1268_v24 = vmul.f32 %v2337_v22, %v2853_v49  ;;  %v1266_v45 = vmul.f32 %v2337_v22, %v2842_v38 }
 0xbf0   :  { %v1249_v10 = vpop.permute.xlu1 %1248 }
 0xbf1   :  { %v1251_v59 = vmul.f32 %v1249_v10, %v1246_v43  ;;  %v1271_v3 = vmul.f32 %v1270_v54, %v1249_v10  ;;  %v1265_v44 = vmul.f32 %v1264_v16, %v1249_v10 }
 0xbf8   :  { %v1261_v63 = vpop.permute.xlu1 %1260 }
 0xbf9   :  { %v1263_v4 = vmul.f32 %v1261_v63, %v1258_v60  ;;  %v1275_v13 = vmul.f32 %v1274_v62, %v1261_v63  ;;  %v1269_v58 = vmul.f32 %v1268_v24, %v1261_v63 }
 0xbfb   :  { %v1308_v53 = vpack.c.bf16 %v1275_v13, %v1275_v13  ;;  %v2238_v28 = vpack.i.bf16 %v1263_v4, %v1271_v3  ;;  %v2276_v4 = vld [vmem:[%s3046_s4 + $0x20] sm:$0xff]   ;;  %v2277_v13 = vld [vmem:[%s3046_s4 + $0x28] sm:$0xff]  }
 0xbfc   :  { %v1255_v26 = vpop.permute.xlu1 %1254 }
 0xbfd   :  { %v1257_v46 = vmul.f32 %v1255_v26, %v1252_v19  ;;  %v1273_v29 = vmul.f32 %v1272_v20, %v1255_v26  ;;  %2162 = vmatmul.mubr.msk.bf16.vlgmr.msra.gmra.mrb[36].mxu1 %vm50_vm1, %v1308_v53  ;;  %v1267_v55 = vmul.f32 %v1266_v45, %v1255_v26 }
 0xbfe   :  { %2169 = vmatprep.mubr.msk.bf16.mxu1 %vm2375_vm0, %v3059_v12  ;;  %2166 = vmatpush3.bf16.msra.mxu1 %v2274_v11 }
 0xbff   :  { %v2233_v2 = vpack.i.bf16 %v1257_v46, %v1269_v58  ;;  %v2243_v41 = vpack.i.bf16 %v1265_v44, %v1273_v29  ;;  %2167 = vmatprep.subr.bf16.mxu1 %v3059_v12 }
 0xc01   :  { %2234 = vrot.lane.b32.xlu1 %v2233_v2, %s2377_s19  ;;  %2244 = vrot.lane.b32.xlu0 %v2243_v41, %s2376_s16 }
 0xc02   :  { %2168 = vmatpush3.bf16.msra.mxu1 %v2275_v18 }
 0xc03   :  { %2181 = vmatprep.subr.bf16.mxu1 %v3059_v12 }
 0xc05   :  { %2239 = vrot.lane.b32.xlu1 %v2238_v28, %s2378_s20  ;;  %v1939_v28 = vld [vmem:[%s3047_s6 + $0x9] ss:$0 sm:$0xff] }
 0xc73   :  { %v2235_v40 = vpop.permute.xlu1 %2234  ;;  %v2245_v32 = vpop.permute.xlu0 %2244 }
 0xc74   :  { %v2237_v49 = vunpack.i.h.bf16 %v2235_v40  ;;  %v2236_v27 = vunpack.i.l.bf16 %v2235_v40  ;;  %v2247_v0 = vunpack.i.h.bf16 %v2245_v32  ;;  %v2246_v30 = vunpack.i.l.bf16 %v2245_v32 }
 0xc76   :  { %v1300_v33 = vsel %vm50_vm1, %v1251_v59, %v2237_v49  ;;  %v1303_v42 = vsel %vm50_vm1, %v1267_v55, %v2236_v27 }
 0xc77   :  { %v2240_v17 = vpop.permute.xlu1 %2239 }
 0xc78   :  { %v2242_v1 = vunpack.i.h.bf16 %v2240_v17  ;;  %v2241_v37 = vunpack.i.l.bf16 %v2240_v17  ;;  %v2278_v17 = vld [vmem:[%s3046_s4 + $0x30] sm:$0xff]  }
 0xc7a   :  { %v1301_v31 = vsel %vm603_vm4, %v1300_v33, %v2242_v1  ;;  %v1304_v34 = vsel %vm603_vm4, %v1303_v42, %v2241_v37  ;;  %v2279_v1 = vld [vmem:[%s3046_s4 + $0x38] sm:$0xff]  }
 0xc7b   :  { %v1302_v35 = vsel %vm605_vm5, %v1301_v31, %v2247_v0  ;;  %v1305_v38 = vsel %vm605_vm5, %v1304_v34, %v2246_v30  ;;  %v1943_v31 = vld [vmem:[%s3047_s6 + $0xa] ss:$0 sm:$0xff] }
 0xc7c   :  { %v1306_v36 = vpack.c.bf16 %v1302_v35, %v1302_v35  ;;  %v1307_v39 = vpack.c.bf16 %v1305_v38, %v1305_v38 }
 0xc7e   :  { %1344 = vmatprep.mubr.bf16.mxu0 %v1307_v39 }
 0xc7f   :  { %1345 = vmatmul.mubr.bf16.vlgmr.msra.gmra.mrb[36].mxu0 %v1306_v36 }
 0xc80   :  { %2177 = vmatprep.mubr.msk.bf16.mxu0 %vm2375_vm0, %v3059_v12  ;;  %2174 = vmatpush3.bf16.msra.mxu0 %v2276_v4  ;;  %v2282_v4 = vld [vmem:[%s3042_s3 + $0xc0] sm:$0xff]  }
 0xc81   :  { %2175 = vmatprep.subr.bf16.mxu0 %v3059_v12 }
 0xc84   :  { %2176 = vmatpush3.bf16.msra.mxu0 %v2277_v13  ;;  %v2283_v13 = vld [vmem:[%s3042_s3 + $0xc8] sm:$0xff]  }
 0xc85   :  { %2189 = vmatprep.subr.bf16.mxu0 %v3059_v12 }
 0xcd0   :  { %v1386_v47 = vpop.f32.mrb[36].mxu1 }
 0xcd1   :  { %v2163_v48 = vpop.f32.mrb[37].mxu1 }
 0xcd2   :  { %v1389_v50 = vpop.f32.mrb[38].mxu1 }
 0xcd3   :  { %v2164_v25 = vpop.f32.mrb[39].mxu1 }
 0xd52   :  { %v2030_v8 = vpop.f32.mrb[36].mxu0 }
 0xd53   :  { %v2031_v5 = vpop.f32.mrb[37].mxu0 }
 0xd54   :  { %v2032_v51 = vadd.f32 %v2031_v5, %v2030_v8  ;;  %v2033_v14 = vpop.f32.mrb[38].mxu0 }
 0xd55   :  { %v2034_v56 = vpop.f32.mrb[39].mxu0  ;;  %v2281_v14 = vld [vmem:[%s3046_s4 + $0x48] sm:$0xff]  }
 0xd56   :  { %v1347_v21 = vadd.f32 %v2032_v51, %v2781_v6  ;;  %v2280_v51 = vld [vmem:[%s3046_s4 + $0x40] sm:$0xff]  }
 0xd58   :  { %v1387_v23 = vadd.f32 %v1386_v47, %v1347_v21 }
 0xd5a   :  { %v1392_v9 = vmax.f32 %v1387_v23, 0.0 }
 0xd5c   :  { %v1398_v61 = vpack.c.bf16 %v1392_v9, %v1392_v9 }
 0xd5e   :  { %2170 = vmatmul.mubr.msk.bf16.vlgmr.msra.gmra.mrb[40].mxu1 %vm50_vm1, %v1398_v61 }
 0xd5f   :  { %2185 = vmatprep.mubr.msk.bf16.mxu1 %vm2375_vm0, %v3059_v12  ;;  %2182 = vmatpush3.bf16.msra.mxu1 %v2278_v17 }
 0xd60   :  { %2183 = vmatprep.subr.bf16.mxu1 %v3059_v12 }
 0xd63   :  { %2184 = vmatpush3.bf16.msra.mxu1 %v2279_v1 }
 0xd64   :  { %2197 = vmatprep.subr.bf16.mxu1 %v3059_v12 }
 0xe31   :  { %v1452_v57 = vpop.f32.mrb[40].mxu1 }
 0xe32   :  { %v1453_v15 = vadd.f32 %v1935_v7, %v1452_v57  ;;  %v2171_v43 = vpop.f32.mrb[41].mxu1  ;;  %v1947_v7 = vld [vmem:[%s3047_s6 + $0xb] ss:$0 sm:$0xff] }
 0xe33   :  { %v1455_v10 = vpop.f32.mrb[42].mxu1 }
 0xe34   :  { %2338 = vtanh.f32 %v1453_v15  ;;  %v2172_v59 = vpop.f32.mrb[43].mxu1  ;;  %v1458_v6 = vsub.f32 0.0, %v1453_v15 }
 0xe36   :  { %v1459_v22 = vmul.f32 1.442695, %v1458_v6 }
 0xe38   :  { %2340 = vpow2.f32 %v1459_v22 }
 0xe3e   :  { %v2339_v52 = vpop.eup %2338 }
 0xe3f   :  { %1465 = vrot.lane.b32.xlu1 %v2339_v52, %s2376_s16 }
 0xe42   :  { %v2341_v54 = vpop.eup %2340 }
 0xe43   :  { %v1461_v60 = vadd.f32 1.0, %v2341_v54 }
 0xe45   :  { %2342 = vrcp.f32 %v1461_v60 }
 0xe4f   :  { %v2343_v62 = vpop.eup %2342 }
 0xeb1   :  { %v1466_v63 = vpop.permute.xlu1 %1465 }
 0xeb2   :  { %v1468_v3 = vmul.f32 %v2343_v62, %v1466_v63 }
 0xeb4   :  { %2344 = vtanh.f32 %v1468_v3 }
 0xebe   :  { %v2345_v16 = vpop.eup %2344 }
 0xebf   :  { %1471 = vrot.lane.b32.xlu1 %v2345_v16, %s2378_s20 }
 0xf31   :  { %v1472_v19 = vpop.permute.xlu1 %1471 }
 0xf32   :  { %v1474_v24 = vmul.f32 %v2343_v62, %v1472_v19  ;;  %v2284_v19 = vld [vmem:[%s3046_s4 + $0x50] sm:$0xff]  }
 0xf34   :  { %v1480_v53 = vpack.c.bf16 %v1474_v24, %v1474_v24 }
 0xf36   :  { %1486 = vrot.lane.b32.xlu1 %v1480_v53, %s2378_s20 }
 0xfa8   :  { %v1487_v20 = vpop.permute.xlu1 %1486 }
 0xfa9   :  { %2178 = vmatmul.mubr.msk.bf16.vlgmr.msra.gmra.mrb[40].mxu0 %vm50_vm1, %v1487_v20 }
 0xfaa   :  { %2193 = vmatprep.mubr.msk.bf16.mxu0 %vm2375_vm0, %v3059_v12  ;;  %2190 = vmatpush3.bf16.msra.mxu0 %v2280_v51 }
 0xfab   :  { %2191 = vmatprep.subr.bf16.mxu0 %v3059_v12 }
 0xfae   :  { %2192 = vmatpush3.bf16.msra.mxu0 %v2281_v14 }
 0xfaf   :  { %2205 = vmatprep.subr.bf16.mxu0 %v3059_v12 }
0x107c   :  { %v1537_v26 = vpop.f32.mrb[40].mxu0 }
0x107d   :  { %v1538_v44 = vadd.f32 %v1939_v28, %v1537_v26  ;;  %v2179_v58 = vpop.f32.mrb[41].mxu0  ;;  %v2285_v26 = vld [vmem:[%s3046_s4 + $0x58] sm:$0xff]  }
0x107e   :  { %v1540_v46 = vpop.f32.mrb[42].mxu0 }
0x107f   :  { %2346 = vtanh.f32 %v1538_v44  ;;  %v2180_v29 = vpop.f32.mrb[43].mxu0  ;;  %v1543_v41 = vsub.f32 0.0, %v1538_v44  ;;  %v1951_v44 = vld [vmem:[%s3044_s5 + $0x60] ss:$0 sm:$0xff] }
0x1081   :  { %v1544_v40 = vmul.f32 1.442695, %v1543_v41 }
0x1083   :  { %2348 = vpow2.f32 %v1544_v40 }
0x1089   :  { %v2347_v2 = vpop.eup %2346 }
0x108a   :  { %1550 = vrot.lane.b32.xlu1 %v2347_v2, %s2376_s16 }
0x108d   :  { %v2349_v45 = vpop.eup %2348 }
0x108e   :  { %v1546_v49 = vadd.f32 1.0, %v2349_v45  ;;  %v1955_v45 = vld [vmem:[%s3047_s6 + $0x10] ss:$0 sm:$0xff] }
0x1090   :  { %2350 = vrcp.f32 %v1546_v49 }
0x109a   :  { %v2351_v27 = vpop.eup %2350 }
0x10fc   :  { %v1551_v32 = vpop.permute.xlu1 %1550 }
0x10fd   :  { %v1553_v55 = vmul.f32 %v2351_v27, %v1551_v32 }
0x10ff   :  { %2352 = vtanh.f32 %v1553_v55 }
0x1109   :  { %v2353_v37 = vpop.eup %2352 }
0x110a   :  { %1556 = vrot.lane.b32.xlu1 %v2353_v37, %s2378_s20 }
0x117c   :  { %v1557_v33 = vpop.permute.xlu1 %1556 }
0x117d   :  { %v1559_v42 = vmul.f32 %v2351_v27, %v1557_v33 }
0x117f   :  { %v1565_v0 = vpack.c.bf16 %v1559_v42, %v1559_v42 }
0x1181   :  { %1571 = vrot.lane.b32.xlu1 %v1565_v0, %s2378_s20 }
0x11f3   :  { %v1572_v30 = vpop.permute.xlu1 %1571 }
0x11f4   :  { %2186 = vmatmul.mubr.msk.bf16.vlgmr.msra.gmra.mrb[44].mxu1 %vm50_vm1, %v1572_v30 }
0x11f5   :  { %2201 = vmatprep.mubr.msk.bf16.mxu1 %vm2375_vm0, %v3059_v12  ;;  %2198 = vmatpush3.bf16.msra.mxu1 %v2282_v4 }
0x11f6   :  { %2199 = vmatprep.subr.bf16.mxu1 %v3059_v12 }
0x11f9   :  { %2200 = vmatpush3.bf16.msra.mxu1 %v2283_v13 }
0x12c7   :  { %v1622_v34 = vpop.f32.mrb[44].mxu1 }
0x12c8   :  { %v1623_v35 = vadd.f32 %v1943_v31, %v1622_v34  ;;  %v2187_v38 = vpop.f32.mrb[45].mxu1 }
0x12c9   :  { %v1625_v36 = vpop.f32.mrb[46].mxu1 }
0x12ca   :  { %2354 = vtanh.f32 %v1623_v35  ;;  %v2188_v39 = vpop.f32.mrb[47].mxu1  ;;  %v1628_v48 = vsub.f32 0.0, %v1623_v35 }
0x12cc   :  { %v1629_v50 = vmul.f32 1.442695, %v1628_v48 }
0x12ce   :  { %2356 = vpow2.f32 %v1629_v50 }
0x12d4   :  { %v2355_v47 = vpop.eup %2354 }
0x12d5   :  { %1635 = vrot.lane.b32.xlu1 %v2355_v47, %s2376_s16 }
0x12d8   :  { %v2357_v25 = vpop.eup %2356 }
0x12d9   :  { %v1631_v11 = vadd.f32 1.0, %v2357_v25 }
0x12db   :  { %2358 = vrcp.f32 %v1631_v11 }
0x12e5   :  { %v2359_v18 = vpop.eup %2358 }
0x1347   :  { %v1636_v8 = vpop.permute.xlu1 %1635 }
0x1348   :  { %v1638_v5 = vmul.f32 %v2359_v18, %v1636_v8 }
0x134a   :  { %2360 = vtanh.f32 %v1638_v5 }
0x1354   :  { %v2361_v56 = vpop.eup %2360 }
0x1355   :  { %1641 = vrot.lane.b32.xlu1 %v2361_v56, %s2378_s20 }
0x13c7   :  { %v1642_v21 = vpop.permute.xlu1 %1641 }
0x13c8   :  { %v1644_v23 = vmul.f32 %v2359_v18, %v1642_v21 }
0x13ca   :  { %v1650_v9 = vpack.c.bf16 %v1644_v23, %v1644_v23 }
0x13cc   :  { %1656 = vrot.lane.b32.xlu1 %v1650_v9, %s2378_s20 }
0x143e   :  { %v1657_v61 = vpop.permute.xlu1 %1656 }
0x143f   :  { %2194 = vmatmul.mubr.msk.bf16.vlgmr.msra.gmra.mrb[44].mxu0 %vm50_vm1, %v1657_v61 }
0x1440   :  { %2209 = vmatprep.mubr.msk.bf16.mxu0 %vm2375_vm0, %v3059_v12  ;;  %2206 = vmatpush3.bf16.msra.mxu0 %v2284_v19 }
0x1441   :  { %2207 = vmatprep.subr.bf16.mxu0 %v3059_v12 }
0x1444   :  { %2208 = vmatpush3.bf16.msra.mxu0 %v2285_v26 }
0x1512   :  { %v1707_v57 = vpop.f32.mrb[44].mxu0 }
0x1513   :  { %v1708_v15 = vadd.f32 %v1947_v7, %v1707_v57  ;;  %v2195_v43 = vpop.f32.mrb[45].mxu0 }
0x1514   :  { %v1710_v10 = vpop.f32.mrb[46].mxu0 }
0x1515   :  { %2362 = vtanh.f32 %v1708_v15  ;;  %v2196_v59 = vpop.f32.mrb[47].mxu0  ;;  %v1713_v6 = vsub.f32 0.0, %v1708_v15 }
0x1517   :  { %v1714_v22 = vmul.f32 1.442695, %v1713_v6 }
0x1519   :  { %2364 = vpow2.f32 %v1714_v22 }
0x151f   :  { %v2363_v52 = vpop.eup %2362 }
0x1520   :  { %1720 = vrot.lane.b32.xlu1 %v2363_v52, %s2376_s16 }
0x1523   :  { %v2365_v54 = vpop.eup %2364 }
0x1524   :  { %v1716_v60 = vadd.f32 1.0, %v2365_v54 }
0x1526   :  { %2366 = vrcp.f32 %v1716_v60 }
0x1530   :  { %v2367_v62 = vpop.eup %2366 }
0x1592   :  { %v1721_v63 = vpop.permute.xlu1 %1720 }
0x1593   :  { %v1723_v3 = vmul.f32 %v2367_v62, %v1721_v63 }
0x1595   :  { %2368 = vtanh.f32 %v1723_v3 }
0x159f   :  { %v2369_v16 = vpop.eup %2368 }
0x15a0   :  { %1726 = vrot.lane.b32.xlu0 %v2369_v16, %s2378_s20 }
0x1612   :  { %v1727_v24 = vpop.permute.xlu0 %1726 }
0x1613   :  { %v1729_v53 = vmul.f32 %v2367_v62, %v1727_v24 }
0x1615   :  { %v1730_v20 = vpack.c.bf16 %v1729_v53, %v1729_v53 }
0x1617   :  { %1741 = vrot.lane.b32.xlu1 %v1730_v20, %s2378_s20 }
0x1689   :  { %v1742_v28 = vpop.permute.xlu1 %1741 }
0x168a   :  { %2202 = vmatmul.mubr.msk.bf16.vlgmr.msra.gmra.mrb[48].mxu1 %vm50_vm1, %v1742_v28 }
0x175d   :  { %v1792_v58 = vpop.f32.mrb[48].mxu1 }
0x175e   :  { %v1793_v46 = vadd.f32 %v1951_v44, %v1792_v58  ;;  %v2203_v12 = vpop.f32.mrb[49].mxu1 }
0x175f   :  { %v1795_v29 = vpop.f32.mrb[50].mxu1 }
0x1760   :  { %v1798_v2 = vmax.f32 %v1793_v46, 0.0  ;;  %v2204_v41 = vpop.f32.mrb[51].mxu1 }
0x1762   :  { %v1799_v40 = vpack.c.bf16 %v1798_v2, %v1798_v2 }
0x1764   :  { %2210 = vmatmul.mubr.msk.bf16.vlgmr.msra.gmra.mrb[48].mxu0 %vm50_vm1, %v1799_v40 }
0x1837   :  { %v1858_v49 = vpop.f32.mrb[48].mxu0 }
0x1838   :  { %v1859_v27 = vadd.f32 %v1955_v45, %v1858_v49  ;;  %v2211_v32 = vpop.f32.mrb[49].mxu0 }
0x1839   :  { %v1861_v55 = vpop.f32.mrb[50].mxu0 }
0x183a   :  { %1864 = vmax.xlane.f32.xlu0 %v1859_v27  ;;  %v2212_v17 = vpop.f32.mrb[51].mxu0 }
0x18c7   :  { %v1865_v1 = vpop.xlane.xlu0 %1864 }
0x18c8   :  { %v1866_v37 = vsub.f32 %v1859_v27, %v1865_v1 }
0x18ca   :  { %v1867_v33 = vmul.f32 1.442695, %v1866_v37 }
0x18cc   :  { %2370 = vpow2.f32 %v1867_v33 }
0x18d6   :  { %v2371_v42 = vpop.eup %2370 }
0x18d7   :  { %1869 = vadd.xlane.f32.xlu1 %v2371_v42 }
0x1964   :  { %v1870_v0 = vpop.xlane.xlu1 %1869 }
0x1965   :  { %2372 = vlog2.f32 %v1870_v0 }
0x196f   :  { %v2373_v30 = vpop.eup %2372 }
0x1970   :  { %v1872_v31 = vmul.f32 0.6931472, %v2373_v30 }
0x1972   :  { %v1873_v34 = vadd.f32 %v1872_v31, %v1865_v1 }
0x1974   :  { %v1874_v35 = vsub.f32 %v1859_v27, %v1873_v34 }
0x1976   :  { %1875 = vst [vmem:[%s3049_s7] sm:$0xff] %v1874_v35 }

</bundles_post_ra>
